<compile_context>
chip_gen: v6e
topology: v6e:2x2x1
jax: 0.10.0
libtpu: 0.0.40
codegen_flags: <defaults>
</compile_context>

<pallas_src>
import numpy as np

import jax
import jax.numpy as jnp
from jax.experimental import pallas as pl
from jax.experimental.pallas import tpu as pltpu  # noqa: F401  (TPU backend)


# ----------------------------- fused Pallas kernel ---------------------------

def _cnn_fused_kernel(x_ref, w1b_ref, b1_ref, s1_ref, w2b_ref, b2_ref, s2_ref,
                      s3_ref, wf1_ref, bf1_ref, wf2_ref, bf2_ref, wf3_ref,
                      bf3_ref, o_ref):
    f32 = jnp.float32
    n1 = s1_ref.shape[2]   # B*32  (conv1 output rows, incl. junk rows h>=28)
    n2 = s2_ref.shape[2]   # B*14  (conv2 output rows, incl. junk rows h>=10)

    # ---- conv1 + bias + ReLU: 5 row-shifted banded matmuls --------------
    # x: (B*32+4, 96)  [row = b*32+h, lane = w*3+cin],  w1b[dy]: (96, 256)
    acc1 = jnp.dot(x_ref[0:n1, :], w1b_ref[0], preferred_element_type=f32)
    for dy in range(1, 5):
        acc1 = acc1 + jnp.dot(x_ref[dy:dy + n1, :], w1b_ref[dy],
                              preferred_element_type=f32)
    h1 = jnp.maximum(acc1 + b1_ref[...], 0.0)            # (B*32, 256)

    # ---- maxpool1: width pairs = the two 128-lane halves; height pairs
    # picked out (and rows re-packed densely) by 0/1 selection matmuls.
    wmax1 = jnp.maximum(h1[:, 0:128], h1[:, 128:256])    # (B*32, 128)
    p1 = jnp.maximum(jnp.dot(s1_ref[0], wmax1, preferred_element_type=f32),
                     jnp.dot(s1_ref[1], wmax1, preferred_element_type=f32))
    # p1: (B*14+4, 128)  [row = b*14+hp, lane = wp*6+c], padded zero rows.

    # ---- conv2 + bias + ReLU -------------------------------------------
    acc2 = jnp.dot(p1[0:n2, :], w2b_ref[0], preferred_element_type=f32)
    for dy in range(1, 5):
        acc2 = acc2 + jnp.dot(p1[dy:dy + n2, :], w2b_ref[dy],
                              preferred_element_type=f32)
    h2 = jnp.maximum(acc2 + b2_ref[...], 0.0)            # (B*14, 256)

    # ---- maxpool2 -------------------------------------------------------
    wmax2 = jnp.maximum(h2[:, 0:128], h2[:, 128:256])    # (B*14, 128)
    p2 = jnp.maximum(jnp.dot(s2_ref[0], wmax2, preferred_element_type=f32),
                     jnp.dot(s2_ref[1], wmax2, preferred_element_type=f32))
    # p2: (B*5, 128)  [row = b*5+hp2, lane = wp2*16+c]

    # ---- fc1 (+ReLU): PyTorch NCHW flatten folded into pre-permuted
    # weights; sum over the 5 pooled rows via per-hp selection matmuls.
    acc3 = jnp.dot(jnp.dot(s3_ref[0], p2, preferred_element_type=f32),
                   wf1_ref[0], preferred_element_type=f32)
    for hp in range(1, 5):
        rows = jnp.dot(s3_ref[hp], p2, preferred_element_type=f32)   # (B,128)
        acc3 = acc3 + jnp.dot(rows, wf1_ref[hp], preferred_element_type=f32)
    z1 = jnp.maximum(acc3 + bf1_ref[...], 0.0)           # (B, 120)

    # ---- fc2 (+ReLU), fc3 (logits) --------------------------------------
    z2 = jnp.maximum(jnp.dot(z1, wf2_ref[...], preferred_element_type=f32)
                     + bf2_ref[...], 0.0)                # (B, 84)
    o_ref[...] = (jnp.dot(z2, wf3_ref[...], preferred_element_type=f32)
                  + bf3_ref[...]).astype(o_ref.dtype)    # (B, 10)


def cnn_forward(x_nchw, packed):
    B = x_nchw.shape[0]
    assert x_nchw.shape[1:] == (3, 32, 32), x_nchw.shape

    # Pack input: NCHW -> NHWC -> (B*32, 96) with row = b*32+h, lane = w*3+c.
    # 4 zero rows of padding keep the dy-shifted row slices in bounds.
    x = jnp.transpose(x_nchw, (0, 2, 3, 1)).astype(jnp.float32)
    x = x.reshape(B * 32, 32 * 3)
    x = jnp.pad(x, ((0, 4), (0, 0)))

    args = (x, packed["w1b"], packed["b1"], packed["s1"], packed["w2b"],
            packed["b2"], packed["s2"], packed["s3"], packed["wf1"],
            packed["bf1"], packed["wf2"], packed["bf2"], packed["wf3"],
            packed["bf3"])

    def full_spec(shape):
        nd = len(shape)
        return pl.BlockSpec(shape, lambda i, _nd=nd: (0,) * _nd)

    return pl.pallas_call(
        _cnn_fused_kernel,
        out_shape=jax.ShapeDtypeStruct((B, 10), jnp.float32),
        grid=(1,),
        in_specs=[full_spec(a.shape) for a in args],
        out_specs=full_spec((B, 10)),
    )(*args)


# ----------------------- one-time host-side weight packing -------------------

def pack_params(params, batch):
    """Rearrange PyTorch-layout params into the fused-kernel layout (host side,
    one-time cost)."""
    B = batch
    w1 = np.asarray(params["conv1_w"], np.float32)   # (6, 3, 5, 5)
    b1 = np.asarray(params["conv1_b"], np.float32)
    w2 = np.asarray(params["conv2_w"], np.float32)   # (16, 6, 5, 5)
    b2 = np.asarray(params["conv2_b"], np.float32)
    f1w = np.asarray(params["fc1_w"], np.float32)    # (120, 400)
    f1b = np.asarray(params["fc1_b"], np.float32)
    f2w = np.asarray(params["fc2_w"], np.float32)    # (84, 120)
    f2b = np.asarray(params["fc2_b"], np.float32)
    f3w = np.asarray(params["fc3_w"], np.float32)    # (10, 84)
    f3b = np.asarray(params["fc3_b"], np.float32)

    # conv1: banded weights.  Output lane(wo, cout) = (wo%2)*128 + (wo//2)*6 + cout
    w1b = np.zeros((5, 96, 256), np.float32)
    b1l = np.zeros((1, 256), np.float32)
    for wo in range(28):
        base = (wo % 2) * 128 + (wo // 2) * 6
        b1l[0, base:base + 6] = b1
        for dy in range(5):
            for dx in range(5):
                w = wo + dx
                w1b[dy, w * 3:w * 3 + 3, base:base + 6] = w1[:, :, dy, dx].T

    # conv2: banded weights.  Output lane(wo2, cout) = (wo2%2)*128 + (wo2//2)*16 + cout
    w2b = np.zeros((5, 128, 256), np.float32)
    b2l = np.zeros((1, 256), np.float32)
    for wo in range(10):
        base = (wo % 2) * 128 + (wo // 2) * 16
        b2l[0, base:base + 16] = b2
        for dy in range(5):
            for dx in range(5):
                w = wo + dx
                w2b[dy, w * 6:w * 6 + 6, base:base + 16] = w2[:, :, dy, dx].T

    # Height-pool row selections (even / odd rows), with zero padding rows so
    # conv2's shifted row reads stay well-defined.
    s1 = np.zeros((2, B * 14 + 4, B * 32), np.float32)
    for b in range(B):
        for hp in range(14):
            s1[0, b * 14 + hp, b * 32 + 2 * hp] = 1.0
            s1[1, b * 14 + hp, b * 32 + 2 * hp + 1] = 1.0
    s2 = np.zeros((2, B * 5, B * 14), np.float32)
    for b in range(B):
        for hp in range(5):
            s2[0, b * 5 + hp, b * 14 + 2 * hp] = 1.0
            s2[1, b * 5 + hp, b * 14 + 2 * hp + 1] = 1.0
    # Per-hp row selection of the pooled (B*5, 128) map for the fc1 contraction.
    s3 = np.zeros((5, B, B * 5), np.float32)
    for hp in range(5):
        for b in range(B):
            s3[hp, b, b * 5 + hp] = 1.0

    # fc1 with PyTorch's NCHW flatten (f = c*25 + hp*5 + wp) folded in.
    wf1 = np.zeros((5, 128, 120), np.float32)
    for hp in range(5):
        for wp in range(5):
            for c in range(16):
                wf1[hp, wp * 16 + c, :] = f1w[:, c * 25 + hp * 5 + wp]

    packed = {
        "w1b": w1b, "b1": b1l, "s1": s1,
        "w2b": w2b, "b2": b2l, "s2": s2, "s3": s3,
        "wf1": wf1, "bf1": f1b.reshape(1, 120),
        "wf2": np.ascontiguousarray(f2w.T), "bf2": f2b.reshape(1, 84),
        "wf3": np.ascontiguousarray(f3w.T), "bf3": f3b.reshape(1, 10),
    }
    return {k: jnp.asarray(v) for k, v in packed.items()}


# ------------------------ params & pure-JAX reference ------------------------

def init_params(key):
    # PyTorch-style default init: U(-1/sqrt(fan_in), 1/sqrt(fan_in)).
    def u(k, shape, fan_in):
        bound = 1.0 / (fan_in ** 0.5)
        return jax.random.uniform(k, shape, jnp.float32, -bound, bound)

    ks = jax.random.split(key, 12)
    return {
        "conv1_w": u(ks[0], (6, 3, 5, 5), 75),   "conv1_b": u(ks[1], (6,), 75),
        "conv2_w": u(ks[2], (16, 6, 5, 5), 150), "conv2_b": u(ks[3], (16,), 150),
        "fc1_w": u(ks[4], (120, 400), 400),      "fc1_b": u(ks[5], (120,), 400),
        "fc2_w": u(ks[6], (84, 120), 120),       "fc2_b": u(ks[7], (84,), 120),
        "fc3_w": u(ks[8], (10, 84), 84),         "fc3_b": u(ks[9], (10,), 84),
    }


def reference_forward(x_nchw, params):
    def conv(x, w, b):
        y = jax.lax.conv_general_dilated(
            x, w, (1, 1), "VALID", dimension_numbers=("NCHW", "OIHW", "NCHW"))
        return jax.nn.relu(y + b.reshape(1, -1, 1, 1))

    def pool(x):
        return jax.lax.reduce_window(
            x, -jnp.inf, jax.lax.max, (1, 1, 2, 2), (1, 1, 2, 2), "VALID")

    h = pool(conv(x_nchw, params["conv1_w"], params["conv1_b"]))
    h = pool(conv(h, params["conv2_w"], params["conv2_b"]))
    h = h.reshape(x_nchw.shape[0], 400)
    h = jax.nn.relu(h @ params["fc1_w"].T + params["fc1_b"])
    h = jax.nn.relu(h @ params["fc2_w"].T + params["fc2_b"])
    return h @ params["fc3_w"].T + params["fc3_b"]


# ---------------------------------- main -------------------------------------

if __name__ == "__main__":
    key = jax.random.PRNGKey(0)
    pkey, xkey = jax.random.split(key)
    params = init_params(pkey)
    # Input must be (B, 3, 32, 32) for the 16*5*5 flatten to be consistent.
    x = jax.random.normal(xkey, (2, 3, 32, 32), jnp.float32)

    packed = pack_params(params, batch=x.shape[0])   # one-time host-side packing

    out = jax.jit(cnn_forward)(x, packed)
    out = jax.block_until_ready(out)

    ref = reference_forward(x, params)
    assert out.shape == (2, 10), out.shape
    assert jnp.allclose(out, ref, atol=1e-3, rtol=1e-3), (out, ref)
    print("KERNEL_OK")
</pallas_src>

<mosaic_0001>
module attributes {stable_mosaic.version = 11 : i64} {
  func.func @_cnn_fused_kernel(%arg0: i32, %arg1: memref<68x96xf32, #tpu.memory_space<vmem>>, %arg2: memref<5x96x256xf32, #tpu.memory_space<vmem>>, %arg3: memref<1x256xf32, #tpu.memory_space<vmem>>, %arg4: memref<2x32x64xf32, #tpu.memory_space<vmem>>, %arg5: memref<5x128x256xf32, #tpu.memory_space<vmem>>, %arg6: memref<1x256xf32, #tpu.memory_space<vmem>>, %arg7: memref<2x10x28xf32, #tpu.memory_space<vmem>>, %arg8: memref<5x2x10xf32, #tpu.memory_space<vmem>>, %arg9: memref<5x128x120xf32, #tpu.memory_space<vmem>>, %arg10: memref<1x120xf32, #tpu.memory_space<vmem>>, %arg11: memref<120x84xf32, #tpu.memory_space<vmem>>, %arg12: memref<1x84xf32, #tpu.memory_space<vmem>>, %arg13: memref<84x10xf32, #tpu.memory_space<vmem>>, %arg14: memref<1x10xf32, #tpu.memory_space<vmem>>, %arg15: memref<2x10xf32, #tpu.memory_space<vmem>>) attributes {dimension_semantics = [#tpu.dimension_semantics<arbitrary>], iteration_bounds = array<i64: 1>, scalar_prefetch = 0 : i64, scratch_operands = 0 : i64, tpu.core_type = #tpu.core_type<tc>, window_params = [{pipeline_mode = #tpu.pipeline_mode<synchronous>, transform_indices = @transform_0, window_bounds = array<i64: 68, 96>}, {pipeline_mode = #tpu.pipeline_mode<synchronous>, transform_indices = @transform_1, window_bounds = array<i64: 5, 96, 256>}, {pipeline_mode = #tpu.pipeline_mode<synchronous>, transform_indices = @transform_2, window_bounds = array<i64: 1, 256>}, {pipeline_mode = #tpu.pipeline_mode<synchronous>, transform_indices = @transform_3, window_bounds = array<i64: 2, 32, 64>}, {pipeline_mode = #tpu.pipeline_mode<synchronous>, transform_indices = @transform_4, window_bounds = array<i64: 5, 128, 256>}, {pipeline_mode = #tpu.pipeline_mode<synchronous>, transform_indices = @transform_5, window_bounds = array<i64: 1, 256>}, {pipeline_mode = #tpu.pipeline_mode<synchronous>, transform_indices = @transform_6, window_bounds = array<i64: 2, 10, 28>}, {pipeline_mode = #tpu.pipeline_mode<synchronous>, transform_indices = @transform_7, window_bounds = array<i64: 5, 2, 10>}, {pipeline_mode = #tpu.pipeline_mode<synchronous>, transform_indices = @transform_8, window_bounds = array<i64: 5, 128, 120>}, {pipeline_mode = #tpu.pipeline_mode<synchronous>, transform_indices = @transform_9, window_bounds = array<i64: 1, 120>}, {pipeline_mode = #tpu.pipeline_mode<synchronous>, transform_indices = @transform_10, window_bounds = array<i64: 120, 84>}, {pipeline_mode = #tpu.pipeline_mode<synchronous>, transform_indices = @transform_11, window_bounds = array<i64: 1, 84>}, {pipeline_mode = #tpu.pipeline_mode<synchronous>, transform_indices = @transform_12, window_bounds = array<i64: 84, 10>}, {pipeline_mode = #tpu.pipeline_mode<synchronous>, transform_indices = @transform_13, window_bounds = array<i64: 1, 10>}, {pipeline_mode = #tpu.pipeline_mode<synchronous>, transform_indices = @transform_14, window_bounds = array<i64: 2, 10>}]} {
    %c0 = arith.constant 0 : index
    %c0_0 = arith.constant 0 : index
    %0 = vector.load %arg1[%c0, %c0_0] : memref<68x96xf32, #tpu.memory_space<vmem>>, vector<64x96xf32>
    %c0_1 = arith.constant 0 : index
    %c0_2 = arith.constant 0 : index
    %c0_3 = arith.constant 0 : index
    %1 = vector.load %arg2[%c0_1, %c0_2, %c0_3] : memref<5x96x256xf32, #tpu.memory_space<vmem>>, vector<1x96x256xf32>
    %2 = vector.shape_cast %1 : vector<1x96x256xf32> to vector<96x256xf32>
    %cst = arith.constant dense<0.000000e+00> : vector<64x256xf32>
    %3 = tpu.matmul %0, %2, %cst {dimension_numbers = #tpu.dot_dimension_numbers<[1], [0], [0], [1], [0, 0, 1, 1], [], []>} : vector<64x96xf32>, vector<96x256xf32>, vector<64x256xf32> -> vector<64x256xf32>
    %c1 = arith.constant 1 : index
    %c0_4 = arith.constant 0 : index
    %4 = vector.load %arg1[%c1, %c0_4] : memref<68x96xf32, #tpu.memory_space<vmem>>, vector<64x96xf32>
    %c1_5 = arith.constant 1 : index
    %c0_6 = arith.constant 0 : index
    %c0_7 = arith.constant 0 : index
    %5 = vector.load %arg2[%c1_5, %c0_6, %c0_7] : memref<5x96x256xf32, #tpu.memory_space<vmem>>, vector<1x96x256xf32>
    %6 = vector.shape_cast %5 : vector<1x96x256xf32> to vector<96x256xf32>
    %cst_8 = arith.constant dense<0.000000e+00> : vector<64x256xf32>
    %7 = tpu.matmul %4, %6, %cst_8 {dimension_numbers = #tpu.dot_dimension_numbers<[1], [0], [0], [1], [0, 0, 1, 1], [], []>} : vector<64x96xf32>, vector<96x256xf32>, vector<64x256xf32> -> vector<64x256xf32>
    %8 = arith.addf %3, %7 : vector<64x256xf32>
    %c2 = arith.constant 2 : index
    %c0_9 = arith.constant 0 : index
    %9 = vector.load %arg1[%c2, %c0_9] : memref<68x96xf32, #tpu.memory_space<vmem>>, vector<64x96xf32>
    %c2_10 = arith.constant 2 : index
    %c0_11 = arith.constant 0 : index
    %c0_12 = arith.constant 0 : index
    %10 = vector.load %arg2[%c2_10, %c0_11, %c0_12] : memref<5x96x256xf32, #tpu.memory_space<vmem>>, vector<1x96x256xf32>
    %11 = vector.shape_cast %10 : vector<1x96x256xf32> to vector<96x256xf32>
    %cst_13 = arith.constant dense<0.000000e+00> : vector<64x256xf32>
    %12 = tpu.matmul %9, %11, %cst_13 {dimension_numbers = #tpu.dot_dimension_numbers<[1], [0], [0], [1], [0, 0, 1, 1], [], []>} : vector<64x96xf32>, vector<96x256xf32>, vector<64x256xf32> -> vector<64x256xf32>
    %13 = arith.addf %8, %12 : vector<64x256xf32>
    %c3 = arith.constant 3 : index
    %c0_14 = arith.constant 0 : index
    %14 = vector.load %arg1[%c3, %c0_14] : memref<68x96xf32, #tpu.memory_space<vmem>>, vector<64x96xf32>
    %c3_15 = arith.constant 3 : index
    %c0_16 = arith.constant 0 : index
    %c0_17 = arith.constant 0 : index
    %15 = vector.load %arg2[%c3_15, %c0_16, %c0_17] : memref<5x96x256xf32, #tpu.memory_space<vmem>>, vector<1x96x256xf32>
    %16 = vector.shape_cast %15 : vector<1x96x256xf32> to vector<96x256xf32>
    %cst_18 = arith.constant dense<0.000000e+00> : vector<64x256xf32>
    %17 = tpu.matmul %14, %16, %cst_18 {dimension_numbers = #tpu.dot_dimension_numbers<[1], [0], [0], [1], [0, 0, 1, 1], [], []>} : vector<64x96xf32>, vector<96x256xf32>, vector<64x256xf32> -> vector<64x256xf32>
    %18 = arith.addf %13, %17 : vector<64x256xf32>
    %c4 = arith.constant 4 : index
    %c0_19 = arith.constant 0 : index
    %19 = vector.load %arg1[%c4, %c0_19] : memref<68x96xf32, #tpu.memory_space<vmem>>, vector<64x96xf32>
    %c4_20 = arith.constant 4 : index
    %c0_21 = arith.constant 0 : index
    %c0_22 = arith.constant 0 : index
    %20 = vector.load %arg2[%c4_20, %c0_21, %c0_22] : memref<5x96x256xf32, #tpu.memory_space<vmem>>, vector<1x96x256xf32>
    %21 = vector.shape_cast %20 : vector<1x96x256xf32> to vector<96x256xf32>
    %cst_23 = arith.constant dense<0.000000e+00> : vector<64x256xf32>
    %22 = tpu.matmul %19, %21, %cst_23 {dimension_numbers = #tpu.dot_dimension_numbers<[1], [0], [0], [1], [0, 0, 1, 1], [], []>} : vector<64x96xf32>, vector<96x256xf32>, vector<64x256xf32> -> vector<64x256xf32>
    %23 = arith.addf %18, %22 : vector<64x256xf32>
    %c0_24 = arith.constant 0 : index
    %c0_25 = arith.constant 0 : index
    %24 = vector.load %arg3[%c0_24, %c0_25] : memref<1x256xf32, #tpu.memory_space<vmem>>, vector<1x256xf32>
    %25 = vector.broadcast %24 : vector<1x256xf32> to vector<64x256xf32>
    %26 = arith.addf %23, %25 : vector<64x256xf32>
    %cst_26 = arith.constant 0.000000e+00 : f32
    %27 = vector.broadcast %cst_26 : f32 to vector<64x256xf32>
    %28 = arith.maximumf %26, %27 : vector<64x256xf32>
    %29 = vector.extract_strided_slice %28 {offsets = [0, 0], sizes = [64, 128], strides = [1, 1]} : vector<64x256xf32> to vector<64x128xf32>
    %30 = vector.extract_strided_slice %28 {offsets = [0, 128], sizes = [64, 128], strides = [1, 1]} : vector<64x256xf32> to vector<64x128xf32>
    %31 = arith.maximumf %29, %30 : vector<64x128xf32>
    %c0_27 = arith.constant 0 : index
    %c0_28 = arith.constant 0 : index
    %c0_29 = arith.constant 0 : index
    %32 = vector.load %arg4[%c0_27, %c0_28, %c0_29] : memref<2x32x64xf32, #tpu.memory_space<vmem>>, vector<1x32x64xf32>
    %33 = vector.shape_cast %32 : vector<1x32x64xf32> to vector<32x64xf32>
    %cst_30 = arith.constant dense<0.000000e+00> : vector<32x128xf32>
    %34 = tpu.matmul %33, %31, %cst_30 {dimension_numbers = #tpu.dot_dimension_numbers<[1], [0], [0], [1], [0, 0, 1, 1], [], []>} : vector<32x64xf32>, vector<64x128xf32>, vector<32x128xf32> -> vector<32x128xf32>
    %c1_31 = arith.constant 1 : index
    %c0_32 = arith.constant 0 : index
    %c0_33 = arith.constant 0 : index
    %35 = vector.load %arg4[%c1_31, %c0_32, %c0_33] : memref<2x32x64xf32, #tpu.memory_space<vmem>>, vector<1x32x64xf32>
    %36 = vector.shape_cast %35 : vector<1x32x64xf32> to vector<32x64xf32>
    %cst_34 = arith.constant dense<0.000000e+00> : vector<32x128xf32>
    %37 = tpu.matmul %36, %31, %cst_34 {dimension_numbers = #tpu.dot_dimension_numbers<[1], [0], [0], [1], [0, 0, 1, 1], [], []>} : vector<32x64xf32>, vector<64x128xf32>, vector<32x128xf32> -> vector<32x128xf32>
    %38 = arith.maximumf %34, %37 : vector<32x128xf32>
    %39 = vector.extract_strided_slice %38 {offsets = [0, 0], sizes = [28, 128], strides = [1, 1]} : vector<32x128xf32> to vector<28x128xf32>
    %c0_35 = arith.constant 0 : index
    %c0_36 = arith.constant 0 : index
    %c0_37 = arith.constant 0 : index
    %40 = vector.load %arg5[%c0_35, %c0_36, %c0_37] : memref<5x128x256xf32, #tpu.memory_space<vmem>>, vector<1x128x256xf32>
    %41 = vector.shape_cast %40 : vector<1x128x256xf32> to vector<128x256xf32>
    %cst_38 = arith.constant dense<0.000000e+00> : vector<28x256xf32>
    %42 = tpu.matmul %39, %41, %cst_38 {dimension_numbers = #tpu.dot_dimension_numbers<[1], [0], [0], [1], [0, 0, 1, 1], [], []>} : vector<28x128xf32>, vector<128x256xf32>, vector<28x256xf32> -> vector<28x256xf32>
    %43 = vector.extract_strided_slice %38 {offsets = [1, 0], sizes = [28, 128], strides = [1, 1]} : vector<32x128xf32> to vector<28x128xf32>
    %c1_39 = arith.constant 1 : index
    %c0_40 = arith.constant 0 : index
    %c0_41 = arith.constant 0 : index
    %44 = vector.load %arg5[%c1_39, %c0_40, %c0_41] : memref<5x128x256xf32, #tpu.memory_space<vmem>>, vector<1x128x256xf32>
    %45 = vector.shape_cast %44 : vector<1x128x256xf32> to vector<128x256xf32>
    %cst_42 = arith.constant dense<0.000000e+00> : vector<28x256xf32>
    %46 = tpu.matmul %43, %45, %cst_42 {dimension_numbers = #tpu.dot_dimension_numbers<[1], [0], [0], [1], [0, 0, 1, 1], [], []>} : vector<28x128xf32>, vector<128x256xf32>, vector<28x256xf32> -> vector<28x256xf32>
    %47 = arith.addf %42, %46 : vector<28x256xf32>
    %48 = vector.extract_strided_slice %38 {offsets = [2, 0], sizes = [28, 128], strides = [1, 1]} : vector<32x128xf32> to vector<28x128xf32>
    %c2_43 = arith.constant 2 : index
    %c0_44 = arith.constant 0 : index
    %c0_45 = arith.constant 0 : index
    %49 = vector.load %arg5[%c2_43, %c0_44, %c0_45] : memref<5x128x256xf32, #tpu.memory_space<vmem>>, vector<1x128x256xf32>
    %50 = vector.shape_cast %49 : vector<1x128x256xf32> to vector<128x256xf32>
    %cst_46 = arith.constant dense<0.000000e+00> : vector<28x256xf32>
    %51 = tpu.matmul %48, %50, %cst_46 {dimension_numbers = #tpu.dot_dimension_numbers<[1], [0], [0], [1], [0, 0, 1, 1], [], []>} : vector<28x128xf32>, vector<128x256xf32>, vector<28x256xf32> -> vector<28x256xf32>
    %52 = arith.addf %47, %51 : vector<28x256xf32>
    %53 = vector.extract_strided_slice %38 {offsets = [3, 0], sizes = [28, 128], strides = [1, 1]} : vector<32x128xf32> to vector<28x128xf32>
    %c3_47 = arith.constant 3 : index
    %c0_48 = arith.constant 0 : index
    %c0_49 = arith.constant 0 : index
    %54 = vector.load %arg5[%c3_47, %c0_48, %c0_49] : memref<5x128x256xf32, #tpu.memory_space<vmem>>, vector<1x128x256xf32>
    %55 = vector.shape_cast %54 : vector<1x128x256xf32> to vector<128x256xf32>
    %cst_50 = arith.constant dense<0.000000e+00> : vector<28x256xf32>
    %56 = tpu.matmul %53, %55, %cst_50 {dimension_numbers = #tpu.dot_dimension_numbers<[1], [0], [0], [1], [0, 0, 1, 1], [], []>} : vector<28x128xf32>, vector<128x256xf32>, vector<28x256xf32> -> vector<28x256xf32>
    %57 = arith.addf %52, %56 : vector<28x256xf32>
    %58 = vector.extract_strided_slice %38 {offsets = [4, 0], sizes = [28, 128], strides = [1, 1]} : vector<32x128xf32> to vector<28x128xf32>
    %c4_51 = arith.constant 4 : index
    %c0_52 = arith.constant 0 : index
    %c0_53 = arith.constant 0 : index
    %59 = vector.load %arg5[%c4_51, %c0_52, %c0_53] : memref<5x128x256xf32, #tpu.memory_space<vmem>>, vector<1x128x256xf32>
    %60 = vector.shape_cast %59 : vector<1x128x256xf32> to vector<128x256xf32>
    %cst_54 = arith.constant dense<0.000000e+00> : vector<28x256xf32>
    %61 = tpu.matmul %58, %60, %cst_54 {dimension_numbers = #tpu.dot_dimension_numbers<[1], [0], [0], [1], [0, 0, 1, 1], [], []>} : vector<28x128xf32>, vector<128x256xf32>, vector<28x256xf32> -> vector<28x256xf32>
    %62 = arith.addf %57, %61 : vector<28x256xf32>
    %c0_55 = arith.constant 0 : index
    %c0_56 = arith.constant 0 : index
    %63 = vector.load %arg6[%c0_55, %c0_56] : memref<1x256xf32, #tpu.memory_space<vmem>>, vector<1x256xf32>
    %64 = vector.broadcast %63 : vector<1x256xf32> to vector<28x256xf32>
    %65 = arith.addf %62, %64 : vector<28x256xf32>
    %cst_57 = arith.constant 0.000000e+00 : f32
    %66 = vector.broadcast %cst_57 : f32 to vector<28x256xf32>
    %67 = arith.maximumf %65, %66 : vector<28x256xf32>
    %68 = vector.extract_strided_slice %67 {offsets = [0, 0], sizes = [28, 128], strides = [1, 1]} : vector<28x256xf32> to vector<28x128xf32>
    %69 = vector.extract_strided_slice %67 {offsets = [0, 128], sizes = [28, 128], strides = [1, 1]} : vector<28x256xf32> to vector<28x128xf32>
    %70 = arith.maximumf %68, %69 : vector<28x128xf32>
    %c0_58 = arith.constant 0 : index
    %c0_59 = arith.constant 0 : index
    %c0_60 = arith.constant 0 : index
    %71 = vector.load %arg7[%c0_58, %c0_59, %c0_60] : memref<2x10x28xf32, #tpu.memory_space<vmem>>, vector<1x10x28xf32>
    %72 = vector.shape_cast %71 : vector<1x10x28xf32> to vector<10x28xf32>
    %cst_61 = arith.constant dense<0.000000e+00> : vector<10x128xf32>
    %73 = tpu.matmul %72, %70, %cst_61 {dimension_numbers = #tpu.dot_dimension_numbers<[1], [0], [0], [1], [0, 0, 1, 1], [], []>} : vector<10x28xf32>, vector<28x128xf32>, vector<10x128xf32> -> vector<10x128xf32>
    %c1_62 = arith.constant 1 : index
    %c0_63 = arith.constant 0 : index
    %c0_64 = arith.constant 0 : index
    %74 = vector.load %arg7[%c1_62, %c0_63, %c0_64] : memref<2x10x28xf32, #tpu.memory_space<vmem>>, vector<1x10x28xf32>
    %75 = vector.shape_cast %74 : vector<1x10x28xf32> to vector<10x28xf32>
    %cst_65 = arith.constant dense<0.000000e+00> : vector<10x128xf32>
    %76 = tpu.matmul %75, %70, %cst_65 {dimension_numbers = #tpu.dot_dimension_numbers<[1], [0], [0], [1], [0, 0, 1, 1], [], []>} : vector<10x28xf32>, vector<28x128xf32>, vector<10x128xf32> -> vector<10x128xf32>
    %77 = arith.maximumf %73, %76 : vector<10x128xf32>
    %c0_66 = arith.constant 0 : index
    %c0_67 = arith.constant 0 : index
    %c0_68 = arith.constant 0 : index
    %78 = vector.load %arg8[%c0_66, %c0_67, %c0_68] : memref<5x2x10xf32, #tpu.memory_space<vmem>>, vector<1x2x10xf32>
    %79 = vector.shape_cast %78 : vector<1x2x10xf32> to vector<2x10xf32>
    %cst_69 = arith.constant dense<0.000000e+00> : vector<2x128xf32>
    %80 = tpu.matmul %79, %77, %cst_69 {dimension_numbers = #tpu.dot_dimension_numbers<[1], [0], [0], [1], [0, 0, 1, 1], [], []>} : vector<2x10xf32>, vector<10x128xf32>, vector<2x128xf32> -> vector<2x128xf32>
    %c0_70 = arith.constant 0 : index
    %c0_71 = arith.constant 0 : index
    %c0_72 = arith.constant 0 : index
    %81 = vector.load %arg9[%c0_70, %c0_71, %c0_72] : memref<5x128x120xf32, #tpu.memory_space<vmem>>, vector<1x128x120xf32>
    %82 = vector.shape_cast %81 : vector<1x128x120xf32> to vector<128x120xf32>
    %cst_73 = arith.constant dense<0.000000e+00> : vector<2x120xf32>
    %83 = tpu.matmul %80, %82, %cst_73 {dimension_numbers = #tpu.dot_dimension_numbers<[1], [0], [0], [1], [0, 0, 1, 1], [], []>} : vector<2x128xf32>, vector<128x120xf32>, vector<2x120xf32> -> vector<2x120xf32>
    %c1_74 = arith.constant 1 : index
    %c0_75 = arith.constant 0 : index
    %c0_76 = arith.constant 0 : index
    %84 = vector.load %arg8[%c1_74, %c0_75, %c0_76] : memref<5x2x10xf32, #tpu.memory_space<vmem>>, vector<1x2x10xf32>
    %85 = vector.shape_cast %84 : vector<1x2x10xf32> to vector<2x10xf32>
    %cst_77 = arith.constant dense<0.000000e+00> : vector<2x128xf32>
    %86 = tpu.matmul %85, %77, %cst_77 {dimension_numbers = #tpu.dot_dimension_numbers<[1], [0], [0], [1], [0, 0, 1, 1], [], []>} : vector<2x10xf32>, vector<10x128xf32>, vector<2x128xf32> -> vector<2x128xf32>
    %c1_78 = arith.constant 1 : index
    %c0_79 = arith.constant 0 : index
    %c0_80 = arith.constant 0 : index
    %87 = vector.load %arg9[%c1_78, %c0_79, %c0_80] : memref<5x128x120xf32, #tpu.memory_space<vmem>>, vector<1x128x120xf32>
    %88 = vector.shape_cast %87 : vector<1x128x120xf32> to vector<128x120xf32>
    %cst_81 = arith.constant dense<0.000000e+00> : vector<2x120xf32>
    %89 = tpu.matmul %86, %88, %cst_81 {dimension_numbers = #tpu.dot_dimension_numbers<[1], [0], [0], [1], [0, 0, 1, 1], [], []>} : vector<2x128xf32>, vector<128x120xf32>, vector<2x120xf32> -> vector<2x120xf32>
    %90 = arith.addf %83, %89 : vector<2x120xf32>
    %c2_82 = arith.constant 2 : index
    %c0_83 = arith.constant 0 : index
    %c0_84 = arith.constant 0 : index
    %91 = vector.load %arg8[%c2_82, %c0_83, %c0_84] : memref<5x2x10xf32, #tpu.memory_space<vmem>>, vector<1x2x10xf32>
    %92 = vector.shape_cast %91 : vector<1x2x10xf32> to vector<2x10xf32>
    %cst_85 = arith.constant dense<0.000000e+00> : vector<2x128xf32>
    %93 = tpu.matmul %92, %77, %cst_85 {dimension_numbers = #tpu.dot_dimension_numbers<[1], [0], [0], [1], [0, 0, 1, 1], [], []>} : vector<2x10xf32>, vector<10x128xf32>, vector<2x128xf32> -> vector<2x128xf32>
    %c2_86 = arith.constant 2 : index
    %c0_87 = arith.constant 0 : index
    %c0_88 = arith.constant 0 : index
    %94 = vector.load %arg9[%c2_86, %c0_87, %c0_88] : memref<5x128x120xf32, #tpu.memory_space<vmem>>, vector<1x128x120xf32>
    %95 = vector.shape_cast %94 : vector<1x128x120xf32> to vector<128x120xf32>
    %cst_89 = arith.constant dense<0.000000e+00> : vector<2x120xf32>
    %96 = tpu.matmul %93, %95, %cst_89 {dimension_numbers = #tpu.dot_dimension_numbers<[1], [0], [0], [1], [0, 0, 1, 1], [], []>} : vector<2x128xf32>, vector<128x120xf32>, vector<2x120xf32> -> vector<2x120xf32>
    %97 = arith.addf %90, %96 : vector<2x120xf32>
    %c3_90 = arith.constant 3 : index
    %c0_91 = arith.constant 0 : index
    %c0_92 = arith.constant 0 : index
    %98 = vector.load %arg8[%c3_90, %c0_91, %c0_92] : memref<5x2x10xf32, #tpu.memory_space<vmem>>, vector<1x2x10xf32>
    %99 = vector.shape_cast %98 : vector<1x2x10xf32> to vector<2x10xf32>
    %cst_93 = arith.constant dense<0.000000e+00> : vector<2x128xf32>
    %100 = tpu.matmul %99, %77, %cst_93 {dimension_numbers = #tpu.dot_dimension_numbers<[1], [0], [0], [1], [0, 0, 1, 1], [], []>} : vector<2x10xf32>, vector<10x128xf32>, vector<2x128xf32> -> vector<2x128xf32>
    %c3_94 = arith.constant 3 : index
    %c0_95 = arith.constant 0 : index
    %c0_96 = arith.constant 0 : index
    %101 = vector.load %arg9[%c3_94, %c0_95, %c0_96] : memref<5x128x120xf32, #tpu.memory_space<vmem>>, vector<1x128x120xf32>
    %102 = vector.shape_cast %101 : vector<1x128x120xf32> to vector<128x120xf32>
    %cst_97 = arith.constant dense<0.000000e+00> : vector<2x120xf32>
    %103 = tpu.matmul %100, %102, %cst_97 {dimension_numbers = #tpu.dot_dimension_numbers<[1], [0], [0], [1], [0, 0, 1, 1], [], []>} : vector<2x128xf32>, vector<128x120xf32>, vector<2x120xf32> -> vector<2x120xf32>
    %104 = arith.addf %97, %103 : vector<2x120xf32>
    %c4_98 = arith.constant 4 : index
    %c0_99 = arith.constant 0 : index
    %c0_100 = arith.constant 0 : index
    %105 = vector.load %arg8[%c4_98, %c0_99, %c0_100] : memref<5x2x10xf32, #tpu.memory_space<vmem>>, vector<1x2x10xf32>
    %106 = vector.shape_cast %105 : vector<1x2x10xf32> to vector<2x10xf32>
    %cst_101 = arith.constant dense<0.000000e+00> : vector<2x128xf32>
    %107 = tpu.matmul %106, %77, %cst_101 {dimension_numbers = #tpu.dot_dimension_numbers<[1], [0], [0], [1], [0, 0, 1, 1], [], []>} : vector<2x10xf32>, vector<10x128xf32>, vector<2x128xf32> -> vector<2x128xf32>
    %c4_102 = arith.constant 4 : index
    %c0_103 = arith.constant 0 : index
    %c0_104 = arith.constant 0 : index
    %108 = vector.load %arg9[%c4_102, %c0_103, %c0_104] : memref<5x128x120xf32, #tpu.memory_space<vmem>>, vector<1x128x120xf32>
    %109 = vector.shape_cast %108 : vector<1x128x120xf32> to vector<128x120xf32>
    %cst_105 = arith.constant dense<0.000000e+00> : vector<2x120xf32>
    %110 = tpu.matmul %107, %109, %cst_105 {dimension_numbers = #tpu.dot_dimension_numbers<[1], [0], [0], [1], [0, 0, 1, 1], [], []>} : vector<2x128xf32>, vector<128x120xf32>, vector<2x120xf32> -> vector<2x120xf32>
    %111 = arith.addf %104, %110 : vector<2x120xf32>
    %c0_106 = arith.constant 0 : index
    %c0_107 = arith.constant 0 : index
    %112 = vector.load %arg10[%c0_106, %c0_107] : memref<1x120xf32, #tpu.memory_space<vmem>>, vector<1x120xf32>
    %113 = vector.broadcast %112 : vector<1x120xf32> to vector<2x120xf32>
    %114 = arith.addf %111, %113 : vector<2x120xf32>
    %cst_108 = arith.constant 0.000000e+00 : f32
    %115 = vector.broadcast %cst_108 : f32 to vector<2x120xf32>
    %116 = arith.maximumf %114, %115 : vector<2x120xf32>
    %c0_109 = arith.constant 0 : index
    %c0_110 = arith.constant 0 : index
    %117 = vector.load %arg11[%c0_109, %c0_110] : memref<120x84xf32, #tpu.memory_space<vmem>>, vector<120x84xf32>
    %cst_111 = arith.constant dense<0.000000e+00> : vector<2x84xf32>
    %118 = tpu.matmul %116, %117, %cst_111 {dimension_numbers = #tpu.dot_dimension_numbers<[1], [0], [0], [1], [0, 0, 1, 1], [], []>} : vector<2x120xf32>, vector<120x84xf32>, vector<2x84xf32> -> vector<2x84xf32>
    %c0_112 = arith.constant 0 : index
    %c0_113 = arith.constant 0 : index
    %119 = vector.load %arg12[%c0_112, %c0_113] : memref<1x84xf32, #tpu.memory_space<vmem>>, vector<1x84xf32>
    %120 = vector.broadcast %119 : vector<1x84xf32> to vector<2x84xf32>
    %121 = arith.addf %118, %120 : vector<2x84xf32>
    %cst_114 = arith.constant 0.000000e+00 : f32
    %122 = vector.broadcast %cst_114 : f32 to vector<2x84xf32>
    %123 = arith.maximumf %121, %122 : vector<2x84xf32>
    %c0_115 = arith.constant 0 : index
    %c0_116 = arith.constant 0 : index
    %124 = vector.load %arg13[%c0_115, %c0_116] : memref<84x10xf32, #tpu.memory_space<vmem>>, vector<84x10xf32>
    %cst_117 = arith.constant dense<0.000000e+00> : vector<2x10xf32>
    %125 = tpu.matmul %123, %124, %cst_117 {dimension_numbers = #tpu.dot_dimension_numbers<[1], [0], [0], [1], [0, 0, 1, 1], [], []>} : vector<2x84xf32>, vector<84x10xf32>, vector<2x10xf32> -> vector<2x10xf32>
    %c0_118 = arith.constant 0 : index
    %c0_119 = arith.constant 0 : index
    %126 = vector.load %arg14[%c0_118, %c0_119] : memref<1x10xf32, #tpu.memory_space<vmem>>, vector<1x10xf32>
    %127 = vector.broadcast %126 : vector<1x10xf32> to vector<2x10xf32>
    %128 = arith.addf %125, %127 : vector<2x10xf32>
    %c0_120 = arith.constant 0 : index
    %c0_121 = arith.constant 0 : index
    %129 = vector.load %arg15[%c0_120, %c0_121] : memref<2x10xf32, #tpu.memory_space<vmem>>, vector<2x10xf32>
    tpu.vector_store %arg15[%c0_120, %c0_121], %128 {strides = array<i32>} : memref<2x10xf32, #tpu.memory_space<vmem>>, vector<2x10xf32>,
    return
  }
  func.func @transform_0(%arg0: i32) -> (i32, i32) {
    %c0_i32 = arith.constant 0 : i32
    %c0_i32_0 = arith.constant 0 : i32
    %c0_i32_1 = arith.constant 0 : i32
    return %c0_i32, %c0_i32_0 : i32, i32
  }
  func.func @transform_1(%arg0: i32) -> (i32, i32, i32) {
    %c0_i32 = arith.constant 0 : i32
    %c0_i32_0 = arith.constant 0 : i32
    %c0_i32_1 = arith.constant 0 : i32
    %c0_i32_2 = arith.constant 0 : i32
    return %c0_i32, %c0_i32_0, %c0_i32_1 : i32, i32, i32
  }
  func.func @transform_2(%arg0: i32) -> (i32, i32) {
    %c0_i32 = arith.constant 0 : i32
    %c0_i32_0 = arith.constant 0 : i32
    %c0_i32_1 = arith.constant 0 : i32
    return %c0_i32, %c0_i32_0 : i32, i32
  }
  func.func @transform_3(%arg0: i32) -> (i32, i32, i32) {
    %c0_i32 = arith.constant 0 : i32
    %c0_i32_0 = arith.constant 0 : i32
    %c0_i32_1 = arith.constant 0 : i32
    %c0_i32_2 = arith.constant 0 : i32
    return %c0_i32, %c0_i32_0, %c0_i32_1 : i32, i32, i32
  }
  func.func @transform_4(%arg0: i32) -> (i32, i32, i32) {
    %c0_i32 = arith.constant 0 : i32
    %c0_i32_0 = arith.constant 0 : i32
    %c0_i32_1 = arith.constant 0 : i32
    %c0_i32_2 = arith.constant 0 : i32
    return %c0_i32, %c0_i32_0, %c0_i32_1 : i32, i32, i32
  }
  func.func @transform_5(%arg0: i32) -> (i32, i32) {
    %c0_i32 = arith.constant 0 : i32
    %c0_i32_0 = arith.constant 0 : i32
    %c0_i32_1 = arith.constant 0 : i32
    return %c0_i32, %c0_i32_0 : i32, i32
  }
  func.func @transform_6(%arg0: i32) -> (i32, i32, i32) {
    %c0_i32 = arith.constant 0 : i32
    %c0_i32_0 = arith.constant 0 : i32
    %c0_i32_1 = arith.constant 0 : i32
    %c0_i32_2 = arith.constant 0 : i32
    return %c0_i32, %c0_i32_0, %c0_i32_1 : i32, i32, i32
  }
  func.func @transform_7(%arg0: i32) -> (i32, i32, i32) {
    %c0_i32 = arith.constant 0 : i32
    %c0_i32_0 = arith.constant 0 : i32
    %c0_i32_1 = arith.constant 0 : i32
    %c0_i32_2 = arith.constant 0 : i32
    return %c0_i32, %c0_i32_0, %c0_i32_1 : i32, i32, i32
  }
  func.func @transform_8(%arg0: i32) -> (i32, i32, i32) {
    %c0_i32 = arith.constant 0 : i32
    %c0_i32_0 = arith.constant 0 : i32
    %c0_i32_1 = arith.constant 0 : i32
    %c0_i32_2 = arith.constant 0 : i32
    return %c0_i32, %c0_i32_0, %c0_i32_1 : i32, i32, i32
  }
  func.func @transform_9(%arg0: i32) -> (i32, i32) {
    %c0_i32 = arith.constant 0 : i32
    %c0_i32_0 = arith.constant 0 : i32
    %c0_i32_1 = arith.constant 0 : i32
    return %c0_i32, %c0_i32_0 : i32, i32
  }
  func.func @transform_10(%arg0: i32) -> (i32, i32) {
    %c0_i32 = arith.constant 0 : i32
    %c0_i32_0 = arith.constant 0 : i32
    %c0_i32_1 = arith.constant 0 : i32
    return %c0_i32, %c0_i32_0 : i32, i32
  }
  func.func @transform_11(%arg0: i32) -> (i32, i32) {
    %c0_i32 = arith.constant 0 : i32
    %c0_i32_0 = arith.constant 0 : i32
    %c0_i32_1 = arith.constant 0 : i32
    return %c0_i32, %c0_i32_0 : i32, i32
  }
  func.func @transform_12(%arg0: i32) -> (i32, i32) {
    %c0_i32 = arith.constant 0 : i32
    %c0_i32_0 = arith.constant 0 : i32
    %c0_i32_1 = arith.constant 0 : i32
    return %c0_i32, %c0_i32_0 : i32, i32
  }
  func.func @transform_13(%arg0: i32) -> (i32, i32) {
    %c0_i32 = arith.constant 0 : i32
    %c0_i32_0 = arith.constant 0 : i32
    %c0_i32_1 = arith.constant 0 : i32
    return %c0_i32, %c0_i32_0 : i32, i32
  }
  func.func @transform_14(%arg0: i32) -> (i32, i32) {
    %c0_i32 = arith.constant 0 : i32
    %c0_i32_0 = arith.constant 0 : i32
    %c0_i32_1 = arith.constant 0 : i32
    return %c0_i32, %c0_i32_0 : i32, i32
  }
}

</mosaic_0001>

<bundles_post_ra>
// kernel: cnn_forward.1
= control target key start
LH: loop header
LB: loop body
LE: loop exit
PB: predicated region body
PF: predicated region fallthrough
CT: control target
= control target key end

     0   :  { %19 = vsyncpa [#allocation3], 0  ;;  %s5967_s0 = inlined_call_operand.vmem [shape: f32[68,96], index: 0, kind: input, shape index: {}]   ;;  %s5968_s1 = inlined_call_operand.vmem [shape: f32[5,96,256], index: 1, kind: input, shape index: {}]   ;;  %s5969_s2 = inlined_call_operand.vmem [shape: f32[1,256], index: 2, kind: input, shape index: {}]   ;;  %s5970_s3 = inlined_call_operand.vmem [shape: f32[2,32,64], index: 3, kind: input, shape index: {}]   ;;  %s5971_s4 = inlined_call_operand.vmem [shape: f32[5,128,256], index: 4, kind: input, shape index: {}]   ;;  %s5972_s5 = inlined_call_operand.vmem [shape: f32[1,256], index: 5, kind: input, shape index: {}]   ;;  %s5973_s6 = inlined_call_operand.vmem [shape: f32[2,10,28], index: 6, kind: input, shape index: {}]   ;;  %s5974_s7 = inlined_call_operand.hbm [shape: f32[5,2,10], index: 7, kind: input, shape index: {}]   ;;  %s5975_s8 = inlined_call_operand.vmem [shape: f32[5,128,120], index: 8, kind: input, shape index: {}]   ;;  %s5976_s9 = inlined_call_operand.vmem [shape: f32[1,120], index: 9, kind: input, shape index: {}]   ;;  %s5977_s10 = inlined_call_operand.vmem [shape: f32[120,84], index: 10, kind: input, shape index: {}]   ;;  %s5978_s11 = inlined_call_operand.vmem [shape: f32[1,84], index: 11, kind: input, shape index: {}]   ;;  %s5979_s12 = inlined_call_operand.vmem [shape: f32[84,10], index: 12, kind: input, shape index: {}]   ;;  %s5980_s13 = inlined_call_operand.vmem [shape: f32[1,10], index: 13, kind: input, shape index: {}]   ;;  %s5981_s14 = inlined_call_operand.hbm [shape: f32[2,10], index: 14, kind: output, shape index: {}]  }
   0x1   :  { %20 = vsyncpa [#allocation4], 0  ;;  %s4056_s29 = smov [#allocation2]  }
   0x2   :  { %s40_s30 = sshll.u32 %s4056_s29, 4  ;;  %s41_s30 = int_to_ptr.vmem [resolvable:$true] %s40_s30 }
   0x3   :  { %s4020_s15 = scalar_lea.vmem %s41_s30, 160  ;;  %p4025_p1 = scmp.lt.s32.totalorder %s41_s30, %s41_s30 }
   0x4   :  { %p4021_p0 = scmp.ne.s32.totalorder %s41_s30, %s4020_s15  ;;  %p4026_p2 = scmp.lt.s32.totalorder %s4020_s15, %s4020_s15 }
   0x6   :  { %p4027_p3 = por %p4026_p2, %p4025_p1 }
   0x8   :  { %p4028_p4 = pnand %p4027_p3, %p4021_p0 }
   0xa   :  { %4031 = shalt.err (!%p4028_p4)
}
   0xb   :  { %s4057_s16 = smov 32   ;;  %s4058_s17 = smov 2  }
   0xc   :  { %46 = dma.hbm_to_vmem [thread:$0]  %s5974_s7, 160, %s41_s30, [#allocation3], %s4057_s16, %s4057_s16, %s4058_s17  }
   0xd   :  { %4052 = dma.done.wait [#allocation3], 160  }
   0xe   :  { %4053 = vsyncadd [#allocation3], 4294967136  ;;  %v5983_v0 = vmov 0.0   ;;  %v3167_v1 = vld [vmem:[%s5968_s1 + $0x178] sm:$0xff]  ;;  %v3166_v3 = vld [vmem:[%s5968_s1 + $0x170] sm:$0xff]  ;;  %vm127_vm0 = vcmask 785408  }
   0xf   :  { %216 = vmatprep.mubr.f32.mxu0 %v5983_v0  ;;  %353 = vmatprep.mubr.f32.mxu1 %v5983_v0  ;;  %v93_v2 = vld [vmem:[%s5968_s1 + $0xb8] sm:$0xff]  ;;  %v92_v4 = vld [vmem:[%s5968_s1 + $0xb0] sm:$0xff]  ;;  %v3165_v5 = vld [vmem:[%s5968_s1 + $0x168] sm:$0xff]  ;;  %vm1016_vm1 = vcmask 523264   ;;  %vm1289_vm2 = vcmask 1046528   ;;  %vm1796_vm3 = vcmask 1043456  }
  0x10   :  { %160 = vmatprep.subr.mxu0 %v3167_v1  ;;  %297 = vmatprep.subr.mxu1 %v93_v2  ;;  %v91_v6 = vld [vmem:[%s5968_s1 + $0xa8] sm:$0xff]  ;;  %v3164_v7 = vld [vmem:[%s5968_s1 + $0x160] sm:$0xff]  ;;  %v3163_v9 = vld [vmem:[%s5968_s1 + $0x158] sm:$0xff]  ;;  %vm1654_vm4 = vcmask 1044480   ;;  %vm1512_vm5 = vcmask 1045504   ;;  %vm1939_vm6 = vcmask 228352  }
  0x11   :  { %161 = vmatpush1.msra.mxu0 %v3166_v3  ;;  %298 = vmatpush1.msra.mxu1 %v92_v4  ;;  %v90_v8 = vld [vmem:[%s5968_s1 + $0xa0] sm:$0xff]  ;;  %v89_v10 = vld [vmem:[%s5968_s1 + $0x98] sm:$0xff]  ;;  %v3162_v11 = vld [vmem:[%s5968_s1 + $0x150] sm:$0xff]  ;;  %vm4060_vm7 = vmmov 0   ;;  %vm2115_vm8 = vcmask 1041408   ;;  %vm2111_vm9 = vcmask 80896  }
  0x12   :  { %162 = vmatprep.subr.mxu0 %v3165_v5  ;;  %299 = vmatprep.subr.mxu1 %v91_v6  ;;  %v88_v12 = vld [vmem:[%s5968_s1 + $0x90] sm:$0xff]  ;;  %v3161_v13 = vld [vmem:[%s5968_s1 + $0x148] sm:$0xff]  ;;  %v3160_v15 = vld [vmem:[%s5968_s1 + $0x140] sm:$0xff]  ;;  %vm2957_vm10 = vcmask 982016   ;;  %vm3050_vm11 = vcmask 687104   ;;  %vm3127_vm12 = vcmask 74752  }
  0x13   :  { %163 = vmatpush1.msra.mxu0 %v3164_v7  ;;  %300 = vmatpush1.msra.mxu1 %v90_v8  ;;  %v87_v14 = vld [vmem:[%s5968_s1 + $0x88] sm:$0xff]  ;;  %v86_v16 = vld [vmem:[%s5968_s1 + $0x80] sm:$0xff]  ;;  %v3159_v17 = vld [vmem:[%s5968_s1 + $0x138] sm:$0xff] }
  0x14   :  { %164 = vmatprep.subr.mxu0 %v3163_v9  ;;  %301 = vmatprep.subr.mxu1 %v89_v10  ;;  %v85_v18 = vld [vmem:[%s5968_s1 + $0x78] sm:$0xff]  ;;  %v3158_v19 = vld [vmem:[%s5968_s1 + $0x130] sm:$0xff]  ;;  %v3157_v21 = vld [vmem:[%s5968_s1 + $0x128] sm:$0xff] }
  0x15   :  { %165 = vmatpush1.msra.mxu0 %v3162_v11  ;;  %302 = vmatpush1.msra.mxu1 %v88_v12  ;;  %v84_v20 = vld [vmem:[%s5968_s1 + $0x70] sm:$0xff]  ;;  %v83_v22 = vld [vmem:[%s5968_s1 + $0x68] sm:$0xff]  ;;  %v3156_v23 = vld [vmem:[%s5968_s1 + $0x120] sm:$0xff] }
  0x16   :  { %166 = vmatprep.subr.mxu0 %v3161_v13  ;;  %303 = vmatprep.subr.mxu1 %v87_v14  ;;  %v82_v24 = vld [vmem:[%s5968_s1 + $0x60] sm:$0xff]  ;;  %v3155_v25 = vld [vmem:[%s5968_s1 + $0x118] sm:$0xff]  ;;  %v3154_v27 = vld [vmem:[%s5968_s1 + $0x110] sm:$0xff] }
  0x17   :  { %167 = vmatpush1.msra.mxu0 %v3160_v15  ;;  %304 = vmatpush1.msra.mxu1 %v86_v16  ;;  %v81_v26 = vld [vmem:[%s5968_s1 + $0x58] sm:$0xff]  ;;  %v80_v28 = vld [vmem:[%s5968_s1 + $0x50] sm:$0xff]  ;;  %v3153_v29 = vld [vmem:[%s5968_s1 + $0x108] sm:$0xff] }
  0x18   :  { %168 = vmatprep.subr.mxu0 %v3159_v17  ;;  %305 = vmatprep.subr.mxu1 %v85_v18  ;;  %v79_v30 = vld [vmem:[%s5968_s1 + $0x48] sm:$0xff]  ;;  %v3152_v31 = vld [vmem:[%s5968_s1 + $0x100] sm:$0xff]  ;;  %v3151_v33 = vld [vmem:[%s5968_s1 + $0xf8] sm:$0xff] }
  0x19   :  { %169 = vmatpush1.msra.mxu0 %v3158_v19  ;;  %306 = vmatpush1.msra.mxu1 %v84_v20  ;;  %v78_v32 = vld [vmem:[%s5968_s1 + $0x40] sm:$0xff]  ;;  %v77_v34 = vld [vmem:[%s5968_s1 + $0x38] sm:$0xff]  ;;  %v3150_v35 = vld [vmem:[%s5968_s1 + $0xf0] sm:$0xff] }
  0x1a   :  { %170 = vmatprep.subr.mxu0 %v3157_v21  ;;  %307 = vmatprep.subr.mxu1 %v83_v22  ;;  %v76_v36 = vld [vmem:[%s5968_s1 + $0x30] sm:$0xff]  ;;  %v3149_v37 = vld [vmem:[%s5968_s1 + $0xe8] sm:$0xff]  ;;  %v3148_v39 = vld [vmem:[%s5968_s1 + $0xe0] sm:$0xff] }
  0x1b   :  { %171 = vmatpush1.msra.mxu0 %v3156_v23  ;;  %308 = vmatpush1.msra.mxu1 %v82_v24  ;;  %v75_v38 = vld [vmem:[%s5968_s1 + $0x28] sm:$0xff]  ;;  %v74_v40 = vld [vmem:[%s5968_s1 + $0x20] sm:$0xff]  ;;  %v3147_v41 = vld [vmem:[%s5968_s1 + $0xd8] sm:$0xff] }
  0x1c   :  { %172 = vmatprep.subr.mxu0 %v3155_v25  ;;  %309 = vmatprep.subr.mxu1 %v81_v26  ;;  %v73_v42 = vld [vmem:[%s5968_s1 + $0x18] sm:$0xff]  ;;  %v3146_v43 = vld [vmem:[%s5968_s1 + $0xd0] sm:$0xff]  ;;  %v3145_v45 = vld [vmem:[%s5968_s1 + $0xc8] sm:$0xff] }
  0x1d   :  { %173 = vmatpush1.msra.mxu0 %v3154_v27  ;;  %310 = vmatpush1.msra.mxu1 %v80_v28  ;;  %v72_v44 = vld [vmem:[%s5968_s1 + $0x10] sm:$0xff]  ;;  %v71_v46 = vld [vmem:[%s5968_s1 + $0x8] sm:$0xff]  ;;  %v3144_v47 = vld [vmem:[%s5968_s1 + $0xc0] sm:$0xff] }
  0x1e   :  { %174 = vmatprep.subr.mxu0 %v3153_v29  ;;  %311 = vmatprep.subr.mxu1 %v79_v30  ;;  %v70_v48 = vld [vmem:[%s5968_s1] sm:$0xff]  ;;  %v3207_v51 = vld [vmem:[%s5968_s1 + $0x238] sm:$0xff]  ;;  %v3206_v53 = vld [vmem:[%s5968_s1 + $0x230] sm:$0xff] }
  0x1f   :  { %175 = vmatpush1.msra.mxu0 %v3152_v31  ;;  %312 = vmatpush1.msra.mxu1 %v78_v32  ;;  %v94_v49 = vld [vmem:[%s5967_s0 + $0x1] sm:$0xff]  ;;  %v3239_v52 = vld [vmem:[%s5968_s1 + $0x2f8] sm:$0xff]  ;;  %v3238_v54 = vld [vmem:[%s5968_s1 + $0x2f0] sm:$0xff] }
  0x20   :  { %176 = vmatprep.subr.mxu0 %v3151_v33  ;;  %313 = vmatprep.subr.mxu1 %v77_v34  ;;  %v62_v50 = vld [vmem:[%s5967_s0] sm:$0xff]  ;;  %v95_v55 = vld [vmem:[%s5967_s0 + $0x9] sm:$0xff]  ;;  %v96_v61 = vld [vmem:[%s5967_s0 + $0x11] sm:$0xff] }
  0x21   :  { %177 = vmatpush1.msra.mxu0 %v3150_v35  ;;  %314 = vmatpush1.msra.mxu1 %v76_v36  ;;  %v63_v56 = vld [vmem:[%s5967_s0 + $0x8] sm:$0xff]  ;;  %v3204_v59 = vld [vmem:[%s5968_s1 + $0x220] sm:$0xff]  ;;  %v64_v62 = vld [vmem:[%s5967_s0 + $0x10] sm:$0xff] }
  0x22   :  { %178 = vmatprep.subr.mxu0 %v3149_v37  ;;  %315 = vmatprep.subr.mxu1 %v75_v38  ;;  %v3205_v57 = vld [vmem:[%s5968_s1 + $0x228] sm:$0xff]  ;;  %v3236_v60 = vld [vmem:[%s5968_s1 + $0x2e0] sm:$0xff]  ;;  %v3203_v63 = vld [vmem:[%s5968_s1 + $0x218] sm:$0xff] }
  0x23   :  { %179 = vmatpush1.msra.mxu0 %v3148_v39  ;;  %316 = vmatpush1.msra.mxu1 %v74_v40  ;;  %v3237_v58 = vld [vmem:[%s5968_s1 + $0x2e8] sm:$0xff]  ;;  %v3235_v1 = vld [vmem:[%s5968_s1 + $0x2d8] sm:$0xff]  ;;  %v3202_v2 = vld [vmem:[%s5968_s1 + $0x210] sm:$0xff] }
  0x24   :  { %180 = vmatprep.subr.mxu0 %v3147_v41  ;;  %317 = vmatprep.subr.mxu1 %v73_v42  ;;  %v3234_v3 = vld [vmem:[%s5968_s1 + $0x2d0] sm:$0xff]  ;;  %v97_v4 = vld [vmem:[%s5967_s0 + $0x19] sm:$0xff]  ;;  %v3201_v6 = vld [vmem:[%s5968_s1 + $0x208] sm:$0xff] }
  0x25   :  { %181 = vmatpush1.msra.mxu0 %v3146_v43  ;;  %318 = vmatpush1.msra.mxu1 %v72_v44  ;;  %v65_v5 = vld [vmem:[%s5967_s0 + $0x18] sm:$0xff]  ;;  %v3200_v7 = vld [vmem:[%s5968_s1 + $0x200] sm:$0xff]  ;;  %v3233_v9 = vld [vmem:[%s5968_s1 + $0x2c8] sm:$0xff] }
  0x26   :  { %182 = vmatprep.subr.mxu0 %v3145_v45  ;;  %319 = vmatprep.subr.mxu1 %v71_v46  ;;  %v3199_v8 = vld [vmem:[%s5968_s1 + $0x1f8] sm:$0xff]  ;;  %v98_v10 = vld [vmem:[%s5967_s0 + $0x21] sm:$0xff]  ;;  %v3198_v12 = vld [vmem:[%s5968_s1 + $0x1f0] sm:$0xff] }
  0x27   :  { %183 = vmatpush1.msra.mxu0 %v3144_v47  ;;  %320 = vmatpush1.msra.mxu1 %v70_v48  ;;  %v66_v11 = vld [vmem:[%s5967_s0 + $0x20] sm:$0xff]  ;;  %v3197_v14 = vld [vmem:[%s5968_s1 + $0x1e8] sm:$0xff]  ;;  %v3231_v15 = vld [vmem:[%s5968_s1 + $0x2b8] sm:$0xff] }
  0x28   :  { %3168 = vmatmul.mubr.msk.f32.vlgmr.msra.gmra.mxu0 %vm127_vm0, %v94_v49  ;;  %3176 = vmatmul.mubr.msk.f32.vlgmr.msra.gmra.mxu1 %vm127_vm0, %v62_v50  ;;  %v3232_v13 = vld [vmem:[%s5968_s1 + $0x2c0] sm:$0xff]  ;;  %v3230_v17 = vld [vmem:[%s5968_s1 + $0x2b0] sm:$0xff]  ;;  %v67_v19 = vld [vmem:[%s5967_s0 + $0x28] sm:$0xff] }
  0x29   :  { %222 = vmatprep.mubr.f32.mxu0 %v5983_v0  ;;  %359 = vmatprep.mubr.f32.mxu1 %v5983_v0  ;;  %v3196_v16 = vld [vmem:[%s5968_s1 + $0x1e0] sm:$0xff]  ;;  %v99_v18 = vld [vmem:[%s5967_s0 + $0x29] sm:$0xff]  ;;  %v3195_v20 = vld [vmem:[%s5968_s1 + $0x1d8] sm:$0xff] }
  0x2a   :  { %467 = vmatprep.subr.mxu0 %v3207_v51  ;;  %653 = vmatprep.subr.mxu1 %v3239_v52  ;;  %v3229_v21 = vld [vmem:[%s5968_s1 + $0x2a8] sm:$0xff]  ;;  %v3194_v22 = vld [vmem:[%s5968_s1 + $0x1d0] sm:$0xff]  ;;  %v3228_v23 = vld [vmem:[%s5968_s1 + $0x2a0] sm:$0xff] }
  0x2b   :  { %468 = vmatpush1.msra.mxu0 %v3206_v53  ;;  %654 = vmatpush1.msra.mxu1 %v3238_v54  ;;  %v3193_v24 = vld [vmem:[%s5968_s1 + $0x1c8] sm:$0xff]  ;;  %v3227_v25 = vld [vmem:[%s5968_s1 + $0x298] sm:$0xff]  ;;  %v3192_v26 = vld [vmem:[%s5968_s1 + $0x1c0] sm:$0xff] }
  0x2c   :  { %3169 = vmatmul.mubr.msk.f32.gmra.mxu0 %vm127_vm0, %v95_v55  ;;  %3177 = vmatmul.mubr.msk.f32.gmra.mxu1 %vm127_vm0, %v63_v56  ;;  %v3226_v27 = vld [vmem:[%s5968_s1 + $0x290] sm:$0xff]  ;;  %v3191_v30 = vld [vmem:[%s5968_s1 + $0x1b8] sm:$0xff]  ;;  %v3225_v31 = vld [vmem:[%s5968_s1 + $0x288] sm:$0xff] }
  0x2d   :  { %228 = vmatprep.mubr.f32.mxu0 %v5983_v0  ;;  %365 = vmatprep.mubr.f32.mxu1 %v5983_v0  ;;  %v100_v28 = vld [vmem:[%s5967_s0 + $0x31] sm:$0xff]  ;;  %v3224_v33 = vld [vmem:[%s5968_s1 + $0x280] sm:$0xff]  ;;  %v3189_v34 = vld [vmem:[%s5968_s1 + $0x1a8] sm:$0xff] }
  0x2e   :  { %469 = vmatprep.subr.mxu0 %v3205_v57  ;;  %655 = vmatprep.subr.mxu1 %v3237_v58  ;;  %v68_v29 = vld [vmem:[%s5967_s0 + $0x30] sm:$0xff]  ;;  %v3223_v35 = vld [vmem:[%s5968_s1 + $0x278] sm:$0xff]  ;;  %v3188_v36 = vld [vmem:[%s5968_s1 + $0x1a0] sm:$0xff] }
  0x2f   :  { %470 = vmatpush1.msra.mxu0 %v3204_v59  ;;  %656 = vmatpush1.msra.mxu1 %v3236_v60  ;;  %v3190_v32 = vld [vmem:[%s5968_s1 + $0x1b0] sm:$0xff]  ;;  %v101_v38 = vld [vmem:[%s5967_s0 + $0x39] sm:$0xff]  ;;  %v3221_v41 = vld [vmem:[%s5968_s1 + $0x268] sm:$0xff] }
  0x30   :  { %3170 = vmatmul.mubr.msk.f32.gmra.mxu0 %vm127_vm0, %v96_v61  ;;  %3178 = vmatmul.mubr.msk.f32.gmra.mxu1 %vm127_vm0, %v64_v62  ;;  %v3222_v37 = vld [vmem:[%s5968_s1 + $0x270] sm:$0xff]  ;;  %v69_v39 = vld [vmem:[%s5967_s0 + $0x38] sm:$0xff]  ;;  %v3220_v43 = vld [vmem:[%s5968_s1 + $0x260] sm:$0xff] }
  0x31   :  { %234 = vmatprep.mubr.f32.mxu0 %v5983_v0  ;;  %371 = vmatprep.mubr.f32.mxu1 %v5983_v0  ;;  %v3187_v40 = vld [vmem:[%s5968_s1 + $0x198] sm:$0xff]  ;;  %v3186_v42 = vld [vmem:[%s5968_s1 + $0x190] sm:$0xff]  ;;  %v3185_v44 = vld [vmem:[%s5968_s1 + $0x188] sm:$0xff] }
  0x32   :  { %471 = vmatprep.subr.mxu0 %v3203_v63  ;;  %657 = vmatprep.subr.mxu1 %v3235_v1  ;;  %v3219_v45 = vld [vmem:[%s5968_s1 + $0x258] sm:$0xff]  ;;  %v3184_v46 = vld [vmem:[%s5968_s1 + $0x180] sm:$0xff]  ;;  %v3218_v47 = vld [vmem:[%s5968_s1 + $0x250] sm:$0xff] }
  0x33   :  { %472 = vmatpush1.msra.mxu0 %v3202_v2  ;;  %658 = vmatpush1.msra.mxu1 %v3234_v3  ;;  %v402_v48 = vld [vmem:[%s5967_s0 + $0x2] sm:$0xff]  ;;  %v3271_v52 = vld [vmem:[%s5968_s1 + $0x3b8] sm:$0xff]  ;;  %v403_v53 = vld [vmem:[%s5967_s0 + $0xa] sm:$0xff] }
  0x34   :  { %3171 = vmatmul.mubr.msk.f32.gmra.mxu0 %vm127_vm0, %v97_v4  ;;  %3179 = vmatmul.mubr.msk.f32.gmra.mxu1 %vm127_vm0, %v65_v5  ;;  %v3217_v49 = vld [vmem:[%s5968_s1 + $0x248] sm:$0xff]  ;;  %v3216_v50 = vld [vmem:[%s5968_s1 + $0x240] sm:$0xff]  ;;  %v3270_v54 = vld [vmem:[%s5968_s1 + $0x3b0] sm:$0xff] }
  0x35   :  { %473 = vmatprep.subr.mxu0 %v3201_v6  ;;  %240 = vmatprep.mubr.f32.mxu0 %v5983_v0  ;;  %v588_v51 = vld [vmem:[%s5967_s0 + $0x3] sm:$0xff]  ;;  %v589_v56 = vld [vmem:[%s5967_s0 + $0xb] sm:$0xff]  ;;  %v3267_v59 = vld [vmem:[%s5968_s1 + $0x398] sm:$0xff] }
  0x36   :  { %377 = vmatprep.mubr.f32.mxu1 %v5983_v0  ;;  %474 = vmatpush1.msra.mxu0 %v3200_v7  ;;  %v3269_v55 = vld [vmem:[%s5968_s1 + $0x3a8] sm:$0xff]  ;;  %v3268_v57 = vld [vmem:[%s5968_s1 + $0x3a0] sm:$0xff]  ;;  %v404_v58 = vld [vmem:[%s5967_s0 + $0x12] sm:$0xff] }
  0x37   :  { %475 = vmatprep.subr.mxu0 %v3199_v8  ;;  %659 = vmatprep.subr.mxu1 %v3233_v9  ;;  %v3266_v60 = vld [vmem:[%s5968_s1 + $0x390] sm:$0xff]  ;;  %v3265_v62 = vld [vmem:[%s5968_s1 + $0x388] sm:$0xff]  ;;  %v405_v63 = vld [vmem:[%s5967_s0 + $0x1a] sm:$0xff] }
  0x38   :  { %3172 = vmatmul.mubr.msk.f32.gmra.mxu0 %vm127_vm0, %v98_v10  ;;  %3180 = vmatmul.mubr.msk.f32.gmra.mxu1 %vm127_vm0, %v66_v11  ;;  %v590_v61 = vld [vmem:[%s5967_s0 + $0x13] sm:$0xff]  ;;  %v3264_v1 = vld [vmem:[%s5968_s1 + $0x380] sm:$0xff]  ;;  %v3261_v6 = vld [vmem:[%s5968_s1 + $0x368] sm:$0xff] }
  0x39   :  { %476 = vmatpush1.msra.mxu0 %v3198_v12  ;;  %660 = vmatpush1.msra.mxu1 %v3232_v13  ;;  %v3263_v2 = vld [vmem:[%s5968_s1 + $0x378] sm:$0xff]  ;;  %v3262_v4 = vld [vmem:[%s5968_s1 + $0x370] sm:$0xff]  ;;  %v406_v5 = vld [vmem:[%s5967_s0 + $0x22] sm:$0xff] }
  0x3a   :  { %477 = vmatprep.subr.mxu0 %v3197_v14  ;;  %661 = vmatprep.subr.mxu1 %v3231_v15  ;;  %v591_v3 = vld [vmem:[%s5967_s0 + $0x1b] sm:$0xff]  ;;  %v592_v8 = vld [vmem:[%s5967_s0 + $0x23] sm:$0xff]  ;;  %v3258_v11 = vld [vmem:[%s5968_s1 + $0x350] sm:$0xff] }
  0x3b   :  { %246 = vmatprep.mubr.f32.mxu0 %v5983_v0  ;;  %383 = vmatprep.mubr.f32.mxu1 %v5983_v0  ;;  %v3260_v7 = vld [vmem:[%s5968_s1 + $0x360] sm:$0xff]  ;;  %v3259_v9 = vld [vmem:[%s5968_s1 + $0x358] sm:$0xff]  ;;  %v407_v10 = vld [vmem:[%s5967_s0 + $0x2a] sm:$0xff] }
  0x3c   :  { %478 = vmatpush1.msra.mxu0 %v3196_v16  ;;  %662 = vmatpush1.msra.mxu1 %v3230_v17  ;;  %v3257_v12 = vld [vmem:[%s5968_s1 + $0x348] sm:$0xff]  ;;  %v3256_v14 = vld [vmem:[%s5968_s1 + $0x340] sm:$0xff]  ;;  %v408_v15 = vld [vmem:[%s5967_s0 + $0x32] sm:$0xff] }
  0x3d   :  { %3173 = vmatmul.mubr.msk.f32.gmra.mxu0 %vm127_vm0, %v99_v18  ;;  %3181 = vmatmul.mubr.msk.f32.gmra.mxu1 %vm127_vm0, %v67_v19  ;;  %v593_v13 = vld [vmem:[%s5967_s0 + $0x2b] sm:$0xff]  ;;  %v3255_v16 = vld [vmem:[%s5968_s1 + $0x338] sm:$0xff] }
  0x3e   :  { %479 = vmatprep.subr.mxu0 %v3195_v20  ;;  %663 = vmatprep.subr.mxu1 %v3229_v21  ;;  %v3254_v17 = vld [vmem:[%s5968_s1 + $0x330] sm:$0xff]  ;;  %v3253_v18 = vld [vmem:[%s5968_s1 + $0x328] sm:$0xff]  ;;  %v3252_v20 = vld [vmem:[%s5968_s1 + $0x320] sm:$0xff] }
  0x3f   :  { %480 = vmatpush1.msra.mxu0 %v3194_v22  ;;  %664 = vmatpush1.msra.mxu1 %v3228_v23  ;;  %v594_v19 = vld [vmem:[%s5967_s0 + $0x33] sm:$0xff] }
  0x40   :  { %481 = vmatprep.subr.mxu0 %v3193_v24  ;;  %665 = vmatprep.subr.mxu1 %v3227_v25  ;;  %v409_v21 = vld [vmem:[%s5967_s0 + $0x3a] sm:$0xff]  ;;  %v3250_v23 = vld [vmem:[%s5968_s1 + $0x310] sm:$0xff]  ;;  %v3249_v24 = vld [vmem:[%s5968_s1 + $0x308] sm:$0xff] }
  0x41   :  { %252 = vmatprep.mubr.f32.mxu0 %v5983_v0  ;;  %389 = vmatprep.mubr.f32.mxu1 %v5983_v0  ;;  %v3251_v22 = vld [vmem:[%s5968_s1 + $0x318] sm:$0xff] }
  0x42   :  { %482 = vmatpush1.msra.mxu0 %v3192_v26  ;;  %666 = vmatpush1.msra.mxu1 %v3226_v27  ;;  %v595_v25 = vld [vmem:[%s5967_s0 + $0x3b] sm:$0xff]  ;;  %v774_v27 = vld [vmem:[%s5967_s0 + $0x4] sm:$0xff] }
  0x43   :  { %3174 = vmatmul.mubr.msk.f32.gmra.mxu0 %vm127_vm0, %v100_v28  ;;  %3182 = vmatmul.mubr.msk.f32.gmra.mxu1 %vm127_vm0, %v68_v29  ;;  %v3248_v26 = vld [vmem:[%s5968_s1 + $0x300] sm:$0xff]  ;;  %v775_v28 = vld [vmem:[%s5967_s0 + $0xc] sm:$0xff]  ;;  %v776_v29 = vld [vmem:[%s5967_s0 + $0x14] sm:$0xff] }
  0x44   :  { %483 = vmatprep.subr.mxu0 %v3191_v30  ;;  %667 = vmatprep.subr.mxu1 %v3225_v31  ;;  %v777_v30 = vld [vmem:[%s5967_s0 + $0x1c] sm:$0xff]  ;;  %v778_v31 = vld [vmem:[%s5967_s0 + $0x24] sm:$0xff] }
  0x45   :  { %484 = vmatpush1.msra.mxu0 %v3190_v32  ;;  %668 = vmatpush1.msra.mxu1 %v3224_v33  ;;  %v779_v32 = vld [vmem:[%s5967_s0 + $0x2c] sm:$0xff]  ;;  %v780_v33 = vld [vmem:[%s5967_s0 + $0x34] sm:$0xff] }
  0x46   :  { %485 = vmatprep.subr.mxu0 %v3189_v34  ;;  %669 = vmatprep.subr.mxu1 %v3223_v35  ;;  %v781_v34 = vld [vmem:[%s5967_s0 + $0x3c] sm:$0xff] }
  0x47   :  { %258 = vmatprep.mubr.f32.mxu0 %v5983_v0  ;;  %395 = vmatprep.mubr.f32.mxu1 %v5983_v0  ;;  %v1012_v35 = vld [vmem:[%s5970_s3] sm:$0xff] }
  0x48   :  { %486 = vmatpush1.msra.mxu0 %v3188_v36  ;;  %670 = vmatpush1.msra.mxu1 %v3222_v37 }
  0x49   :  { %3175 = vmatmul.mubr.msk.f32.gmra.mxu0 %vm127_vm0, %v101_v38  ;;  %3183 = vmatmul.mubr.msk.f32.gmra.mxu1 %vm127_vm0, %v69_v39 }
  0x4a   :  { %487 = vmatprep.subr.mxu0 %v3187_v40  ;;  %671 = vmatprep.subr.mxu1 %v3221_v41 }
  0x4b   :  { %488 = vmatpush1.msra.mxu0 %v3186_v42  ;;  %672 = vmatpush1.msra.mxu1 %v3220_v43 }
  0x4c   :  { %489 = vmatprep.subr.mxu0 %v3185_v44  ;;  %673 = vmatprep.subr.mxu1 %v3219_v45 }
  0x4d   :  { %490 = vmatpush1.msra.mxu0 %v3184_v46  ;;  %523 = vmatprep.mubr.f32.mxu0 %v5983_v0 }
  0x4e   :  { %674 = vmatpush1.msra.mxu1 %v3218_v47  ;;  %3208 = vmatmul.mubr.msk.f32.vlgmr.msra.gmra.mxu0 %vm127_vm0, %v402_v48 }
  0x4f   :  { %675 = vmatprep.subr.mxu1 %v3217_v49  ;;  %709 = vmatprep.mubr.f32.mxu1 %v5983_v0 }
  0x50   :  { %676 = vmatpush1.msra.mxu1 %v3216_v50  ;;  %529 = vmatprep.mubr.f32.mxu0 %v5983_v0 }
  0x51   :  { %3240 = vmatmul.mubr.msk.f32.vlgmr.msra.gmra.mxu1 %vm127_vm0, %v588_v51  ;;  %839 = vmatprep.subr.mxu0 %v3271_v52 }
  0x52   :  { %3209 = vmatmul.mubr.msk.f32.gmra.mxu0 %vm127_vm0, %v403_v53  ;;  %715 = vmatprep.mubr.f32.mxu1 %v5983_v0 }
  0x53   :  { %535 = vmatprep.mubr.f32.mxu0 %v5983_v0  ;;  %840 = vmatpush1.msra.mxu0 %v3270_v54 }
  0x54   :  { %841 = vmatprep.subr.mxu0 %v3269_v55 }
  0x55   :  { %3241 = vmatmul.mubr.msk.f32.gmra.mxu1 %vm127_vm0, %v589_v56  ;;  %842 = vmatpush1.msra.mxu0 %v3268_v57 }
  0x56   :  { %3210 = vmatmul.mubr.msk.f32.gmra.mxu0 %vm127_vm0, %v404_v58  ;;  %721 = vmatprep.mubr.f32.mxu1 %v5983_v0 }
  0x57   :  { %541 = vmatprep.mubr.f32.mxu0 %v5983_v0  ;;  %843 = vmatprep.subr.mxu0 %v3267_v59 }
  0x58   :  { %844 = vmatpush1.msra.mxu0 %v3266_v60  ;;  %v3323_v60 = vld [vmem:[%s5971_s4 + $0x1f8] sm:$0xff] }
  0x59   :  { %3242 = vmatmul.mubr.msk.f32.gmra.mxu1 %vm127_vm0, %v590_v61  ;;  %845 = vmatprep.subr.mxu0 %v3265_v62  ;;  %v3322_v61 = vld [vmem:[%s5971_s4 + $0x1f0] sm:$0xff]  ;;  %v3321_v62 = vld [vmem:[%s5971_s4 + $0x1e8] sm:$0xff] }
  0x5a   :  { %3211 = vmatmul.mubr.msk.f32.gmra.mxu0 %vm127_vm0, %v405_v63  ;;  %727 = vmatprep.mubr.f32.mxu1 %v5983_v0  ;;  %v3320_v63 = vld [vmem:[%s5971_s4 + $0x1e0] sm:$0xff] }
  0x5b   :  { %547 = vmatprep.mubr.f32.mxu0 %v5983_v0  ;;  %846 = vmatpush1.msra.mxu0 %v3264_v1  ;;  %v3319_v1 = vld [vmem:[%s5971_s4 + $0x1d8] sm:$0xff] }
  0x5c   :  { %847 = vmatprep.subr.mxu0 %v3263_v2 }
  0x5d   :  { %3243 = vmatmul.mubr.msk.f32.gmra.mxu1 %vm127_vm0, %v591_v3  ;;  %848 = vmatpush1.msra.mxu0 %v3262_v4  ;;  %v3318_v4 = vld [vmem:[%s5971_s4 + $0x1d0] sm:$0xff] }
  0x5e   :  { %3212 = vmatmul.mubr.msk.f32.gmra.mxu0 %vm127_vm0, %v406_v5  ;;  %733 = vmatprep.mubr.f32.mxu1 %v5983_v0  ;;  %v3317_v5 = vld [vmem:[%s5971_s4 + $0x1c8] sm:$0xff] }
  0x5f   :  { %849 = vmatprep.subr.mxu0 %v3261_v6  ;;  %553 = vmatprep.mubr.f32.mxu0 %v5983_v0 }
  0x60   :  { %850 = vmatpush1.msra.mxu0 %v3260_v7 }
  0x61   :  { %3244 = vmatmul.mubr.msk.f32.gmra.mxu1 %vm127_vm0, %v592_v8  ;;  %851 = vmatprep.subr.mxu0 %v3259_v9  ;;  %v3316_v8 = vld [vmem:[%s5971_s4 + $0x1c0] sm:$0xff]  ;;  %v3315_v9 = vld [vmem:[%s5971_s4 + $0x1b8] sm:$0xff] }
  0x62   :  { %3213 = vmatmul.mubr.msk.f32.gmra.mxu0 %vm127_vm0, %v407_v10  ;;  %739 = vmatprep.mubr.f32.mxu1 %v5983_v0  ;;  %v3314_v10 = vld [vmem:[%s5971_s4 + $0x1b0] sm:$0xff] }
  0x63   :  { %852 = vmatpush1.msra.mxu0 %v3258_v11  ;;  %559 = vmatprep.mubr.f32.mxu0 %v5983_v0  ;;  %v3313_v11 = vld [vmem:[%s5971_s4 + $0x1a8] sm:$0xff] }
  0x64   :  { %853 = vmatprep.subr.mxu0 %v3257_v12 }
  0x65   :  { %3245 = vmatmul.mubr.msk.f32.gmra.mxu1 %vm127_vm0, %v593_v13  ;;  %854 = vmatpush1.msra.mxu0 %v3256_v14  ;;  %v3312_v14 = vld [vmem:[%s5971_s4 + $0x1a0] sm:$0xff] }
  0x66   :  { %3214 = vmatmul.mubr.msk.f32.gmra.mxu0 %vm127_vm0, %v408_v15  ;;  %855 = vmatprep.subr.mxu0 %v3255_v16  ;;  %v3311_v15 = vld [vmem:[%s5971_s4 + $0x198] sm:$0xff] }
  0x67   :  { %745 = vmatprep.mubr.f32.mxu1 %v5983_v0  ;;  %856 = vmatpush1.msra.mxu0 %v3254_v17  ;;  %v3310_v17 = vld [vmem:[%s5971_s4 + $0x190] sm:$0xff] }
  0x68   :  { %857 = vmatprep.subr.mxu0 %v3253_v18  ;;  %565 = vmatprep.mubr.f32.mxu0 %v5983_v0  ;;  %v3309_v18 = vld [vmem:[%s5971_s4 + $0x188] sm:$0xff] }
  0x69   :  { %3246 = vmatmul.mubr.msk.f32.gmra.mxu1 %vm127_vm0, %v594_v19  ;;  %858 = vmatpush1.msra.mxu0 %v3252_v20 }
  0x6a   :  { %3215 = vmatmul.mubr.msk.f32.gmra.mxu0 %vm127_vm0, %v409_v21  ;;  %859 = vmatprep.subr.mxu0 %v3251_v22 }
  0x6b   :  { %751 = vmatprep.mubr.f32.mxu1 %v5983_v0  ;;  %860 = vmatpush1.msra.mxu0 %v3250_v23 }
  0x6c   :  { %861 = vmatprep.subr.mxu0 %v3249_v24  ;;  %895 = vmatprep.mubr.f32.mxu0 %v5983_v0 }
  0x6d   :  { %3247 = vmatmul.mubr.msk.f32.gmra.mxu1 %vm127_vm0, %v595_v25  ;;  %862 = vmatpush1.msra.mxu0 %v3248_v26 }
  0x6e   :  { %3272 = vmatmul.mubr.msk.f32.vlgmr.msra.gmra.mxu0 %vm127_vm0, %v774_v27  ;;  %3688 = vmatprep.mubr.msk.f32.mxu1 %vm1016_vm1, %v1012_v35 }
  0x6f   :  { %901 = vmatprep.mubr.f32.mxu0 %v5983_v0  ;;  %1301 = vmatprep.subr.mxu0 %v3323_v60 }
  0x70   :  { %1302 = vmatpush1.msra.mxu0 %v3322_v61 }
  0x71   :  { %1303 = vmatprep.subr.mxu0 %v3321_v62 }
  0x72   :  { %3273 = vmatmul.mubr.msk.f32.gmra.mxu0 %vm127_vm0, %v775_v28 }
  0x73   :  { %907 = vmatprep.mubr.f32.mxu0 %v5983_v0  ;;  %1304 = vmatpush1.msra.mxu0 %v3320_v63 }
  0x74   :  { %1305 = vmatprep.subr.mxu0 %v3319_v1 }
  0x75   :  { %1306 = vmatpush1.msra.mxu0 %v3318_v4 }
  0x76   :  { %3274 = vmatmul.mubr.msk.f32.gmra.mxu0 %vm127_vm0, %v776_v29  ;;  %1307 = vmatprep.subr.mxu0 %v3317_v5  ;;  %v960_v5 = vld [vmem:[%s5969_s2] sm:$0x3] }
  0x77   :  { %913 = vmatprep.mubr.f32.mxu0 %v5983_v0  ;;  %1308 = vmatpush1.msra.mxu0 %v3316_v8 }
  0x78   :  { %1309 = vmatprep.subr.mxu0 %v3315_v9 }
  0x79   :  { %1310 = vmatpush1.msra.mxu0 %v3314_v10 }
  0x7a   :  { %3275 = vmatmul.mubr.msk.f32.gmra.mxu0 %vm127_vm0, %v777_v30  ;;  %1311 = vmatprep.subr.mxu0 %v3313_v11 }
  0x7b   :  { %919 = vmatprep.mubr.f32.mxu0 %v5983_v0  ;;  %1312 = vmatpush1.msra.mxu0 %v3312_v14 }
  0x7c   :  { %1313 = vmatprep.subr.mxu0 %v3311_v15 }
  0x7d   :  { %1314 = vmatpush1.msra.mxu0 %v3310_v17 }
  0x7e   :  { %3276 = vmatmul.mubr.msk.f32.gmra.mxu0 %vm127_vm0, %v778_v31  ;;  %1315 = vmatprep.subr.mxu0 %v3309_v18 }
  0x7f   :  { %925 = vmatprep.mubr.f32.mxu0 %v5983_v0 }
  0x82   :  { %3277 = vmatmul.mubr.msk.f32.gmra.mxu0 %vm127_vm0, %v779_v32 }
  0x83   :  { %931 = vmatprep.mubr.f32.mxu0 %v5983_v0 }
  0x86   :  { %3278 = vmatmul.mubr.msk.f32.gmra.mxu0 %vm127_vm0, %v780_v33 }
  0x87   :  { %937 = vmatprep.mubr.f32.mxu0 %v5983_v0 }
  0x8a   :  { %3279 = vmatmul.mubr.msk.f32.gmra.mxu0 %vm127_vm0, %v781_v34 }
  0x8b   :  { %1365 = vmatprep.mubr.f32.mxu0 %v5983_v0 }
  0xe8   :  { %v218_v36 = vpop.f32.mrf.mxu0  ;;  %v355_v37 = vpop.f32.mrf.mxu1 }
  0xe9   :  { %v4705_v38 = vadd.f32 %v355_v37, %v218_v36 }
  0xea   :  { %v220_v39 = vpop.f32.mrf.mxu0  ;;  %v357_v40 = vpop.f32.mrf.mxu1 }
  0xeb   :  { %v4707_v41 = vadd.f32 %v357_v40, %v220_v39 }
  0xec   :  { %v224_v42 = vpop.f32.mrf.mxu0  ;;  %v361_v43 = vpop.f32.mrf.mxu1 }
  0xed   :  { %v4709_v44 = vadd.f32 %v361_v43, %v224_v42 }
  0xee   :  { %v226_v45 = vpop.f32.mrf.mxu0  ;;  %v363_v46 = vpop.f32.mrf.mxu1 }
  0xef   :  { %v4711_v47 = vadd.f32 %v363_v46, %v226_v45  ;;  %v962_v46 = vlaneseq }
  0xf0   :  { %v4713_v48 = vpop.f32.mrf.mxu0  ;;  %v4715_v49 = vpop.f32.mrf.mxu1 }
  0xf1   :  { %v368_v15 = vadd.f32 %v4715_v49, %v4713_v48 }
  0xf2   :  { %v4717_v50 = vpop.f32.mrf.mxu0  ;;  %v4719_v51 = vpop.f32.mrf.mxu1 }
  0xf4   :  { %v4721_v52 = vpop.f32.mrf.mxu0  ;;  %v4723_v53 = vpop.f32.mrf.mxu1 }
  0xf5   :  { %v374_v48 = vadd.f32 %v4723_v53, %v4721_v52 }
  0xf6   :  { %v4725_v54 = vpop.f32.mrf.mxu0  ;;  %v4727_v55 = vpop.f32.mrf.mxu1 }
  0xf8   :  { %v4729_v56 = vpop.f32.mrf.mxu0  ;;  %v4731_v57 = vpop.f32.mrf.mxu1 }
  0xf9   :  { %v380_v52 = vadd.f32 %v4731_v57, %v4729_v56 }
  0xfa   :  { %v4733_v58 = vpop.f32.mrf.mxu0  ;;  %v4735_v59 = vpop.f32.mrf.mxu1 }
  0xfd   :  { %v4752_v2 = vpop.f32.mrf.mxu0  ;;  %v4754_v3 = vpop.f32.mrf.mxu1 }
  0xfe   :  { %v386_v57 = vadd.f32 %v4754_v3, %v4752_v2 }
  0xff   :  { %v4762_v6 = vpop.f32.mrf.mxu0  ;;  %v4764_v7 = vpop.f32.mrf.mxu1 }
 0x103   :  { %v4778_v12 = vpop.f32.mrf.mxu0  ;;  %v4780_v13 = vpop.f32.mrf.mxu1 }
 0x105   :  { %v4788_v16 = vpop.f32.mrf.mxu0  ;;  %v4796_v19 = vpop.f32.mrf.mxu1 }
 0x109   :  { %v4798_v20 = vpop.f32.mrf.mxu0  ;;  %v4800_v21 = vpop.f32.mrf.mxu1 }
 0x10b   :  { %v4802_v22 = vpop.f32.mrf.mxu0  ;;  %v4804_v24 = vpop.f32.mrf.mxu1 }
 0x10e   :  { %v525_v23 = vpop.f32.mrf.mxu0 }
 0x10f   :  { %v572_v25 = vadd.f32 %v525_v23, %v4705_v38 }
 0x110   :  { %v527_v26 = vpop.f32.mrf.mxu0 }
 0x111   :  { %v573_v27 = vadd.f32 %v527_v26, %v4707_v41  ;;  %v711_v28 = vpop.f32.mrf.mxu1 }
 0x112   :  { %v531_v29 = vpop.f32.mrf.mxu0  ;;  %v758_v11 = vadd.f32 %v711_v28, %v572_v25 }
 0x113   :  { %v574_v30 = vadd.f32 %v531_v29, %v4709_v44  ;;  %v713_v31 = vpop.f32.mrf.mxu1  ;;  %v4814_v44 = vshrl.u32 %v962_v46, 7  ;;  %v370_v29 = vadd.f32 %v4719_v51, %v4717_v50 }
 0x114   :  { %v533_v32 = vpop.f32.mrf.mxu0  ;;  %v759_v18 = vadd.f32 %v713_v31, %v573_v27 }
 0x115   :  { %v575_v33 = vadd.f32 %v533_v32, %v4711_v47  ;;  %v717_v34 = vpop.f32.mrf.mxu1  ;;  %v5982_v1 = vsub.s32 0, %v4814_v44  ;;  %v968_v8 = vsub.s32 1, %v4814_v44 }
 0x116   :  { %v537_v35 = vpop.f32.mrf.mxu0  ;;  %v760_v28 = vadd.f32 %v717_v34, %v574_v30 }
 0x117   :  { %v719_v36 = vpop.f32.mrf.mxu1  ;;  %v4831_v14 = vrot.slane %v960_v5, %v5982_v1  ;;  %v4837_v26 = vrot.slane %v960_v5, %v968_v8  ;;  %v576_v32 = vadd.f32 %v537_v35, %v368_v15 }
 0x118   :  { %v539_v37 = vpop.f32.mrf.mxu0  ;;  %v761_v31 = vadd.f32 %v719_v36, %v575_v33 }
 0x119   :  { %v723_v40 = vpop.f32.mrf.mxu1  ;;  %v577_v49 = vadd.f32 %v539_v37, %v370_v29 }
 0x11a   :  { %v543_v39 = vpop.f32.mrf.mxu0  ;;  %v762_v50 = vadd.f32 %v723_v40, %v576_v32 }
 0x11b   :  { %v725_v38 = vpop.f32.mrf.mxu1  ;;  %v578_v51 = vadd.f32 %v543_v39, %v374_v48 }
 0x11c   :  { %v545_v42 = vpop.f32.mrf.mxu0  ;;  %v763_v53 = vadd.f32 %v725_v38, %v577_v49 }
 0x11d   :  { %v729_v60 = vpop.f32.mrf.mxu1 }
 0x11e   :  { %v549_v43 = vpop.f32.mrf.mxu0  ;;  %v764_v39 = vadd.f32 %v729_v60, %v578_v51 }
 0x11f   :  { %v731_v47 = vpop.f32.mrf.mxu1  ;;  %v580_v40 = vadd.f32 %v549_v43, %v380_v52 }
 0x120   :  { %v551_v45 = vpop.f32.mrf.mxu0 }
 0x121   :  { %v735_v9 = vpop.f32.mrf.mxu1 }
 0x122   :  { %v4810_v41 = vpop.f32.mrf.mxu0  ;;  %v766_v43 = vadd.f32 %v735_v9, %v580_v40 }
 0x123   :  { %v737_v46 = vpop.f32.mrf.mxu1  ;;  %v582_v60 = vadd.f32 %v4810_v41, %v386_v57  ;;  %v394_v41 = vadd.f32 %v4796_v19, %v4788_v16 }
 0x124   :  { %v4812_v61 = vpop.f32.mrf.mxu0 }
 0x125   :  { %v741_v35 = vpop.f32.mrf.mxu1 }
 0x126   :  { %v4816_v62 = vpop.f32.mrf.mxu0  ;;  %v768_v9 = vadd.f32 %v741_v35, %v582_v60 }
 0x128   :  { %v4818_v63 = vpop.f32.mrf.mxu0 }
 0x12a   :  { %v4821_v4 = vpop.f32.mrf.mxu0 }
 0x12c   :  { %v4827_v10 = vpop.f32.mrf.mxu0 }
 0x12e   :  { %v897_v17 = vpop.f32.mrf.mxu0 }
 0x12f   :  { %v944_v23 = vadd.f32 %v897_v17, %v758_v11  ;;  %v376_v17 = vadd.f32 %v4727_v55, %v4725_v54  ;;  %v382_v55 = vadd.f32 %v4735_v59, %v4733_v58  ;;  %v388_v59 = vadd.f32 %v4764_v7, %v4762_v6 }
 0x130   :  { %v899_v25 = vpop.f32.mrf.mxu0 }
 0x131   :  { %v972_v1 = vadd.f32 %v4831_v14, %v944_v23  ;;  %v945_v0 = vadd.f32 %v899_v25, %v759_v18  ;;  %v579_v36 = vadd.f32 %v545_v42, %v376_v17  ;;  %v581_v42 = vadd.f32 %v551_v45, %v382_v55 }
 0x132   :  { %v903_v27 = vpop.f32.mrf.mxu0  ;;  %v392_v45 = vadd.f32 %v4780_v13, %v4778_v12  ;;  %v583_v51 = vadd.f32 %v4812_v61, %v388_v59  ;;  %v398_v61 = vadd.f32 %v4800_v21, %v4798_v20 }
 0x133   :  { %v973_v11 = vadd.f32 %v4837_v26, %v945_v0  ;;  %v946_v5 = vadd.f32 %v903_v27, %v760_v28  ;;  %v988_v30 = vmax.f32 %v972_v1, 0.0  ;;  %v743_v1 = vpop.f32.mrf.mxu1  ;;  %v765_v48 = vadd.f32 %v731_v47, %v579_v36 }
 0x134   :  { %v905_v15 = vpop.f32.mrf.mxu0  ;;  %v767_v47 = vadd.f32 %v737_v46, %v581_v42  ;;  %v585_v46 = vadd.f32 %v4818_v63, %v394_v41  ;;  %v3286_v41 = vld [vmem:[%s5970_s3 + $0x30] sm:$0xff] }
 0x135   :  { %v989_v34 = vmax.f32 %v973_v11, 0.0  ;;  %v974_v18 = vadd.f32 %v4831_v14, %v946_v5  ;;  %v947_v23 = vadd.f32 %v905_v15, %v761_v31  ;;  %v747_v31 = vpop.f32.mrf.mxu1 }
 0x136   :  { %v909_v33 = vpop.f32.mrf.mxu0 }
 0x137   :  { %v4850_v0 = vmax.f32 %v988_v30, %v989_v34  ;;  %v975_v37 = vadd.f32 %v4837_v26, %v947_v23  ;;  %v948_v54 = vadd.f32 %v909_v33, %v762_v50  ;;  %v990_v32 = vmax.f32 %v974_v18, 0.0  ;;  %v749_v34 = vpop.f32.mrf.mxu1 }
 0x138   :  { %v911_v29 = vpop.f32.mrf.mxu0  ;;  %v584_v30 = vadd.f32 %v4816_v62, %v392_v45  ;;  %v769_v33 = vadd.f32 %v743_v1, %v583_v51  ;;  %v400_v62 = vadd.f32 %v4804_v24, %v4802_v22  ;;  %v771_v63 = vadd.f32 %v749_v34, %v585_v46  ;;  %v3284_v51 = vld [vmem:[%s5970_s3 + $0x20] sm:$0xff]  ;;  %v1246_v34 = vld [vmem:[%s5971_s4 + $0xd0] sm:$0xff] }
 0x139   :  { %v991_v25 = vmax.f32 %v975_v37, 0.0  ;;  %v976_v28 = vadd.f32 %v4831_v14, %v948_v54  ;;  %v949_v56 = vadd.f32 %v911_v29, %v763_v53  ;;  %v586_v37 = vadd.f32 %v4821_v4, %v398_v61  ;;  %v753_v54 = vpop.f32.mrf.mxu1  ;;  %v1241_v61 = vld [vmem:[%s5971_s4 + $0xa8] sm:$0xff]  ;;  %v1240_v46 = vld [vmem:[%s5971_s4 + $0xa0] sm:$0xff] }
 0x13a   :  { %v915_v38 = vpop.f32.mrf.mxu0  ;;  %v770_v35 = vadd.f32 %v747_v31, %v584_v30  ;;  %v587_v29 = vadd.f32 %v4827_v10, %v400_v62  ;;  %v3287_v30 = vld [vmem:[%s5970_s3 + $0x38] sm:$0xff]  ;;  %v1234_v62 = vld [vmem:[%s5971_s4 + $0x70] sm:$0xff] }
 0x13b   :  { %v4858_v49 = vmax.f32 %v990_v32, %v991_v25  ;;  %v977_v27 = vadd.f32 %v4837_v26, %v949_v56  ;;  %v950_v58 = vadd.f32 %v915_v38, %v764_v39  ;;  %v992_v5 = vmax.f32 %v976_v28, 0.0  ;;  %v755_v22 = vpop.f32.mrf.mxu1 }
 0x13c   :  { %v917_v11 = vpop.f32.mrf.mxu0  ;;  %v772_v56 = vadd.f32 %v753_v54, %v586_v37  ;;  %v1233_v37 = vld [vmem:[%s5971_s4 + $0x68] sm:$0xff]  ;;  %v3307_v54 = vld [vmem:[%s5971_s4 + $0x178] sm:$0xff] }
 0x13d   :  { %v993_v17 = vmax.f32 %v977_v27, 0.0  ;;  %v978_v2 = vadd.f32 %v4831_v14, %v950_v58  ;;  %v951_v3 = vadd.f32 %v917_v11, %v765_v48  ;;  %v773_v27 = vadd.f32 %v755_v22, %v587_v29  ;;  %v3303_v29 = vld [vmem:[%s5971_s4 + $0x158] sm:$0xff]  ;;  %v1226_v22 = vld [vmem:[%s5971_s4 + $0x30] sm:$0xff] }
 0x13e   :  { %v921_v50 = vpop.f32.mrf.mxu0 }
 0x13f   :  { %v4868_v15 = vmax.f32 %v992_v5, %v993_v17  ;;  %v979_v6 = vadd.f32 %v4837_v26, %v951_v3  ;;  %v952_v7 = vadd.f32 %v921_v50, %v766_v43  ;;  %v994_v23 = vmax.f32 %v978_v2, 0.0  ;;  %v1015_v50 = vld [vmem:[%s5970_s3 + $0x18] sm:$0xff] }
 0x140   :  { %v923_v18 = vpop.f32.mrf.mxu0 }
 0x141   :  { %v995_v52 = vmax.f32 %v979_v6, 0.0  ;;  %v980_v12 = vadd.f32 %v4831_v14, %v952_v7  ;;  %v953_v13 = vadd.f32 %v923_v18, %v767_v47  ;;  %v3285_v6 = vld [vmem:[%s5970_s3 + $0x28] sm:$0xff]  ;;  %v1251_v7 = vld [vmem:[%s5971_s4 + $0xf8] sm:$0xff] }
 0x142   :  { %v927_v53 = vpop.f32.mrf.mxu0  ;;  %v1245_v18 = vld [vmem:[%s5971_s4 + $0xc8] sm:$0xff] }
 0x143   :  { %v4878_v36 = vmax.f32 %v994_v23, %v995_v52  ;;  %v981_v16 = vadd.f32 %v4837_v26, %v953_v13  ;;  %v954_v19 = vadd.f32 %v927_v53, %v768_v9  ;;  %v996_v39 = vmax.f32 %v980_v12, 0.0  ;;  %v1248_v9 = vld [vmem:[%s5971_s4 + $0xe0] sm:$0xff]  ;;  %v1243_v52 = vld [vmem:[%s5971_s4 + $0xb8] sm:$0xff]  ;;  %v1242_v13 = vld [vmem:[%s5971_s4 + $0xb0] sm:$0xff] }
 0x144   :  { %v929_v55 = vpop.f32.mrf.mxu0  ;;  %v1244_v23 = vld [vmem:[%s5971_s4 + $0xc0] sm:$0xff]  ;;  %v5985_v12 = vmov 0.0   ;;  %v1239_v53 = vld [vmem:[%s5971_s4 + $0x98] sm:$0xff] }
 0x145   :  { %v997_v40 = vmax.f32 %v981_v16, 0.0  ;;  %v982_v20 = vadd.f32 %v4831_v14, %v954_v19  ;;  %v955_v21 = vadd.f32 %v929_v55, %v769_v33  ;;  %v1238_v33 = vld [vmem:[%s5971_s4 + $0x90] sm:$0xff]  ;;  %v1236_v16 = vld [vmem:[%s5971_s4 + $0x80] sm:$0xff]  ;;  %v1235_v19 = vld [vmem:[%s5971_s4 + $0x78] sm:$0xff] }
 0x146   :  { %v933_v1 = vpop.f32.mrf.mxu0  ;;  %v1232_v55 = vld [vmem:[%s5971_s4 + $0x60] sm:$0xff] }
 0x147   :  { %v1008_v32 = vmax.f32 %v996_v39, %v997_v40  ;;  %v983_v25 = vadd.f32 %v4837_v26, %v955_v21  ;;  %v956_v28 = vadd.f32 %v933_v1, %v770_v35  ;;  %v998_v57 = vmax.f32 %v982_v20, 0.0  ;;  %v3308_v35 = vld [vmem:[%s5971_s4 + $0x180] sm:$0xff]  ;;  %v3306_v39 = vld [vmem:[%s5971_s4 + $0x170] sm:$0xff]  ;;  %v1231_v40 = vld [vmem:[%s5971_s4 + $0x58] sm:$0xff] }
 0x148   :  { %v935_v24 = vpop.f32.mrf.mxu0  ;;  %1316 = vmatpush1.msra.mxu0 %v3308_v35  ;;  %v3305_v20 = vld [vmem:[%s5971_s4 + $0x168] sm:$0xff]  ;;  %v1230_v21 = vld [vmem:[%s5971_s4 + $0x50] sm:$0xff] }
 0x149   :  { %v999_v4 = vmax.f32 %v983_v25, 0.0  ;;  %v984_v42 = vadd.f32 %v4831_v14, %v956_v28  ;;  %v957_v38 = vadd.f32 %v935_v24, %v771_v63  ;;  %1317 = vmatprep.subr.mxu0 %v3307_v54  ;;  %v3304_v63 = vld [vmem:[%s5971_s4 + $0x160] sm:$0xff]  ;;  %v1229_v1 = vld [vmem:[%s5971_s4 + $0x48] sm:$0xff]  ;;  %v3302_v25 = vld [vmem:[%s5971_s4 + $0x150] sm:$0xff] }
 0x14a   :  { %v939_v48 = vpop.f32.mrf.mxu0  ;;  %1318 = vmatpush1.msra.mxu0 %v3306_v39  ;;  %v1227_v28 = vld [vmem:[%s5971_s4 + $0x38] sm:$0xff]  ;;  %v3300_v24 = vld [vmem:[%s5971_s4 + $0x140] sm:$0xff] }
 0x14b   :  { %v1009_v58 = vmax.f32 %v998_v57, %v999_v4  ;;  %v985_v59 = vadd.f32 %v4837_v26, %v957_v38  ;;  %v958_v43 = vadd.f32 %v939_v48, %v772_v56  ;;  %v1000_v10 = vmax.f32 %v984_v42, 0.0  ;;  %1319 = vmatprep.subr.mxu0 %v3305_v20  ;;  %v3301_v56 = vld [vmem:[%s5971_s4 + $0x148] sm:$0xff]  ;;  %v3299_v4 = vld [vmem:[%s5971_s4 + $0x138] sm:$0xff]  ;;  %v1224_v42 = vld [vmem:[%s5971_s4 + $0x20] sm:$0xff] }
 0x14c   :  { %v941_v60 = vpop.f32.mrf.mxu0  ;;  %1320 = vmatpush1.msra.mxu0 %v3304_v63  ;;  %v1225_v57 = vld [vmem:[%s5971_s4 + $0x28] sm:$0xff]  ;;  %v3298_v38 = vld [vmem:[%s5971_s4 + $0x130] sm:$0xff]  ;;  %v1223_v48 = vld [vmem:[%s5971_s4 + $0x18] sm:$0xff] }
 0x14d   :  { %v1001_v31 = vmax.f32 %v985_v59, 0.0  ;;  %v986_v11 = vadd.f32 %v4831_v14, %v958_v43  ;;  %v959_v5 = vadd.f32 %v941_v60, %v773_v27  ;;  %v1013_v14 = vld [vmem:[%s5970_s3 + $0x8] sm:$0xff]  ;;  %1321 = vmatprep.subr.mxu0 %v3303_v29  ;;  %v3296_v59 = vld [vmem:[%s5971_s4 + $0x120] sm:$0xff]  ;;  %v3295_v60 = vld [vmem:[%s5971_s4 + $0x118] sm:$0xff] }
 0x14e   :  { %1322 = vmatpush1.msra.mxu0 %v3302_v25  ;;  %v3297_v27 = vld [vmem:[%s5971_s4 + $0x128] sm:$0xff]  ;;  %v3380_v54 = vld [vmem:[%s5971_s4 + $0x3c0] sm:$0xff]  ;;  %v3379_v20 = vld [vmem:[%s5971_s4 + $0x3b8] sm:$0xff] }
 0x14f   :  { %v1010_v17 = vmax.f32 %v1000_v10, %v1001_v31  ;;  %v987_v2 = vadd.f32 %v4837_v26, %v959_v5  ;;  %v1002_v3 = vmax.f32 %v986_v11, 0.0  ;;  %v1014_v26 = vld [vmem:[%s5970_s3 + $0x10] sm:$0xff]  ;;  %1323 = vmatprep.subr.mxu0 %v3301_v56  ;;  %v1221_v43 = vld [vmem:[%s5971_s4 + $0x8] sm:$0xff]  ;;  %v1220_v10 = vld [vmem:[%s5971_s4] sm:$0xff] }
 0x150   :  { %1324 = vmatpush1.msra.mxu0 %v3300_v24  ;;  %v3294_v31 = vld [vmem:[%s5971_s4 + $0x110] sm:$0xff]  ;;  %v3387_v11 = vld [vmem:[%s5971_s4 + $0x3f8] sm:$0xff]  ;;  %v3293_v5 = vld [vmem:[%s5971_s4 + $0x108] sm:$0xff] }
 0x151   :  { %v1003_v45 = vmax.f32 %v987_v2, 0.0  ;;  %1325 = vmatprep.subr.mxu0 %v3299_v4  ;;  %v3355_v2 = vld [vmem:[%s5971_s4 + $0x2f8] sm:$0xff]  ;;  %v3378_v29 = vld [vmem:[%s5971_s4 + $0x3b0] sm:$0xff]  ;;  %v3377_v25 = vld [vmem:[%s5971_s4 + $0x3a8] sm:$0xff] }
 0x152   :  { %1326 = vmatpush1.msra.mxu0 %v3298_v38  ;;  %v3376_v56 = vld [vmem:[%s5971_s4 + $0x3a0] sm:$0xff]  ;;  %v3346_v24 = vld [vmem:[%s5971_s4 + $0x2b0] sm:$0xff] }
 0x153   :  { %v1011_v47 = vmax.f32 %v1002_v3, %v1003_v45  ;;  %1327 = vmatprep.subr.mxu0 %v3297_v27  ;;  %v3374_v38 = vld [vmem:[%s5971_s4 + $0x390] sm:$0xff]  ;;  %v3373_v27 = vld [vmem:[%s5971_s4 + $0x388] sm:$0xff] }
 0x154   :  { %1328 = vmatpush1.msra.mxu0 %v3296_v59  ;;  %v3372_v59 = vld [vmem:[%s5971_s4 + $0x380] sm:$0xff] }
 0x155   :  { %3672 = vmatprep.subr.mxu1 %v1011_v47  ;;  %1329 = vmatprep.subr.mxu0 %v3295_v60  ;;  %v3342_v60 = vld [vmem:[%s5971_s4 + $0x290] sm:$0xff] }
 0x156   :  { %3673 = vmatpush3.msra.mxu1 %v1011_v47  ;;  %1330 = vmatpush1.msra.mxu0 %v3294_v31  ;;  %v3341_v31 = vld [vmem:[%s5971_s4 + $0x288] sm:$0xff] }
 0x157   :  { %3674 = vmatprep.subr.mxu1 %v1010_v17  ;;  %1331 = vmatprep.subr.mxu0 %v3293_v5  ;;  %v3340_v5 = vld [vmem:[%s5971_s4 + $0x280] sm:$0xff] }
 0x158   :  { %3675 = vmatpush3.msra.mxu1 %v1010_v17 }
 0x159   :  { %3676 = vmatprep.subr.mxu1 %v1009_v58 }
 0x15a   :  { %3677 = vmatpush3.msra.mxu1 %v1009_v58 }
 0x15b   :  { %3678 = vmatprep.subr.mxu1 %v1008_v32 }
 0x15c   :  { %3679 = vmatpush3.msra.mxu1 %v1008_v32 }
 0x15d   :  { %3680 = vmatprep.subr.mxu1 %v4878_v36 }
 0x15e   :  { %3681 = vmatpush3.msra.mxu1 %v4878_v36 }
 0x15f   :  { %3682 = vmatprep.subr.mxu1 %v4868_v15 }
 0x160   :  { %3683 = vmatpush3.msra.mxu1 %v4868_v15 }
 0x161   :  { %3684 = vmatprep.subr.mxu1 %v4858_v49 }
 0x162   :  { %3685 = vmatpush3.msra.mxu1 %v4858_v49 }
 0x163   :  { %3686 = vmatprep.subr.mxu1 %v4850_v0 }
 0x164   :  { %3687 = vmatpush3.msra.mxu1 %v4850_v0 }
 0x165   :  { %3694 = vmatprep.subr.mxu1 %v1011_v47  ;;  %3689 = vmatmul.mubr.msk.f32.vlgmr.msra.gmra.mxu1 %vm1016_vm1, %v1013_v14 }
 0x166   :  { %3695 = vmatpush3.msra.mxu1 %v1011_v47  ;;  %3691 = vmatprep.mubr.msk.f32.mxu1 %vm1016_vm1, %v1014_v26 }
 0x167   :  { %3696 = vmatprep.subr.mxu1 %v1010_v17 }
 0x168   :  { %3697 = vmatpush3.msra.mxu1 %v1010_v17  ;;  %v3292_v17 = vld [vmem:[%s5971_s4 + $0x100] sm:$0xff] }
 0x169   :  { %3698 = vmatprep.subr.mxu1 %v1009_v58  ;;  %3692 = vmatmul.mubr.msk.f32.gmra.mxu1 %vm1016_vm1, %v1015_v50 }
 0x16a   :  { %3699 = vmatpush3.msra.mxu1 %v1009_v58  ;;  %3710 = vmatprep.mubr.msk.f32.mxu1 %vm1016_vm1, %v3284_v51  ;;  %v1222_v58 = vld [vmem:[%s5971_s4 + $0x10] sm:$0xff] }
 0x16b   :  { %3700 = vmatprep.subr.mxu1 %v1008_v32  ;;  %1332 = vmatpush1.msra.mxu0 %v3292_v17  ;;  %v3368_v17 = vld [vmem:[%s5971_s4 + $0x360] sm:$0xff] }
 0x16c   :  { %3701 = vmatpush3.msra.mxu1 %v1008_v32  ;;  %v1228_v32 = vld [vmem:[%s5971_s4 + $0x40] sm:$0xff]  ;;  %1524 = vmatprep.subr.mxu0 %v3355_v2  ;;  %v3339_v2 = vld [vmem:[%s5971_s4 + $0x278] sm:$0xff] }
 0x16d   :  { %3702 = vmatprep.subr.mxu1 %v4878_v36 }
 0x16e   :  { %3703 = vmatpush3.msra.mxu1 %v4878_v36  ;;  %v1237_v36 = vld [vmem:[%s5971_s4 + $0x88] sm:$0xff] }
 0x16f   :  { %3704 = vmatprep.subr.mxu1 %v4868_v15 }
 0x170   :  { %3705 = vmatpush3.msra.mxu1 %v4868_v15  ;;  %v1250_v15 = vld [vmem:[%s5971_s4 + $0xf0] sm:$0xff] }
 0x171   :  { %3706 = vmatprep.subr.mxu1 %v4858_v49 }
 0x172   :  { %3707 = vmatpush3.msra.mxu1 %v4858_v49  ;;  %v1249_v49 = vld [vmem:[%s5971_s4 + $0xe8] sm:$0xff] }
 0x173   :  { %3708 = vmatprep.subr.mxu1 %v4850_v0 }
 0x174   :  { %3709 = vmatpush3.msra.mxu1 %v4850_v0  ;;  %v1247_v0 = vld [vmem:[%s5971_s4 + $0xd8] sm:$0xff] }
 0x175   :  { %3711 = vmatmul.mubr.msk.f32.vlgmr.msra.gmra.mxu1 %vm1016_vm1, %v3285_v6  ;;  %1390 = vmatprep.subr.mxu1 %v1251_v7  ;;  %v3386_v7 = vld [vmem:[%s5971_s4 + $0x3f0] sm:$0xff] }
 0x176   :  { %3713 = vmatprep.mubr.msk.f32.mxu1 %vm1016_vm1, %v3286_v41  ;;  %1391 = vmatpush1.msra.mxu1 %v1250_v15  ;;  %v3385_v15 = vld [vmem:[%s5971_s4 + $0x3e8] sm:$0xff] }
 0x177   :  { %1392 = vmatprep.subr.mxu1 %v1249_v49  ;;  %v3384_v49 = vld [vmem:[%s5971_s4 + $0x3e0] sm:$0xff] }
 0x178   :  { %1393 = vmatpush1.msra.mxu1 %v1248_v9 }
 0x179   :  { %3714 = vmatmul.mubr.msk.f32.gmra.mxu1 %vm1016_vm1, %v3287_v30  ;;  %1394 = vmatprep.subr.mxu1 %v1247_v0 }
 0x17a   :  { %1395 = vmatpush1.msra.mxu1 %v1246_v34  ;;  %1454 = vmatprep.mubr.f32.mxu1 %v5985_v12  ;;  %v3354_v34 = vld [vmem:[%s5971_s4 + $0x2f0] sm:$0xff] }
 0x17b   :  { %1396 = vmatprep.subr.mxu1 %v1245_v18  ;;  %v3383_v18 = vld [vmem:[%s5971_s4 + $0x3d8] sm:$0xff] }
 0x17c   :  { %1397 = vmatpush1.msra.mxu1 %v1244_v23 }
 0x17d   :  { %1398 = vmatprep.subr.mxu1 %v1243_v52 }
 0x17e   :  { %1399 = vmatpush1.msra.mxu1 %v1242_v13 }
 0x17f   :  { %1400 = vmatprep.subr.mxu1 %v1241_v61 }
 0x180   :  { %1401 = vmatpush1.msra.mxu1 %v1240_v46 }
 0x181   :  { %1402 = vmatprep.subr.mxu1 %v1239_v53  ;;  %v3353_v53 = vld [vmem:[%s5971_s4 + $0x2e8] sm:$0xff] }
 0x182   :  { %1403 = vmatpush1.msra.mxu1 %v1238_v33  ;;  %v3382_v33 = vld [vmem:[%s5971_s4 + $0x3d0] sm:$0xff] }
 0x183   :  { %1404 = vmatprep.subr.mxu1 %v1237_v36  ;;  %v3352_v36 = vld [vmem:[%s5971_s4 + $0x2e0] sm:$0xff] }
 0x184   :  { %1405 = vmatpush1.msra.mxu1 %v1236_v16 }
 0x185   :  { %1406 = vmatprep.subr.mxu1 %v1235_v19  ;;  %v3381_v19 = vld [vmem:[%s5971_s4 + $0x3c8] sm:$0xff] }
 0x186   :  { %1407 = vmatpush1.msra.mxu1 %v1234_v62 }
 0x187   :  { %1408 = vmatprep.subr.mxu1 %v1233_v37  ;;  %v3351_v37 = vld [vmem:[%s5971_s4 + $0x2d8] sm:$0xff] }
 0x188   :  { %1409 = vmatpush1.msra.mxu1 %v1232_v55 }
 0x189   :  { %1410 = vmatprep.subr.mxu1 %v1231_v40  ;;  %v3350_v40 = vld [vmem:[%s5971_s4 + $0x2d0] sm:$0xff] }
 0x18a   :  { %1411 = vmatpush1.msra.mxu1 %v1230_v21  ;;  %v3349_v21 = vld [vmem:[%s5971_s4 + $0x2c8] sm:$0xff] }
 0x18b   :  { %1412 = vmatprep.subr.mxu1 %v1229_v1 }
 0x18c   :  { %1413 = vmatpush1.msra.mxu1 %v1228_v32  ;;  %v3348_v32 = vld [vmem:[%s5971_s4 + $0x2c0] sm:$0xff] }
 0x18d   :  { %1414 = vmatprep.subr.mxu1 %v1227_v28  ;;  %v3347_v28 = vld [vmem:[%s5971_s4 + $0x2b8] sm:$0xff] }
 0x18e   :  { %1415 = vmatpush1.msra.mxu1 %v1226_v22 }
 0x18f   :  { %1416 = vmatprep.subr.mxu1 %v1225_v57  ;;  %v3375_v57 = vld [vmem:[%s5971_s4 + $0x398] sm:$0xff] }
 0x190   :  { %1417 = vmatpush1.msra.mxu1 %v1224_v42  ;;  %v3345_v42 = vld [vmem:[%s5971_s4 + $0x2a8] sm:$0xff] }
 0x191   :  { %1418 = vmatprep.subr.mxu1 %v1223_v48  ;;  %v3344_v48 = vld [vmem:[%s5971_s4 + $0x2a0] sm:$0xff] }
 0x192   :  { %1419 = vmatpush1.msra.mxu1 %v1222_v58  ;;  %v3343_v58 = vld [vmem:[%s5971_s4 + $0x298] sm:$0xff] }
 0x193   :  { %1420 = vmatprep.subr.mxu1 %v1221_v43  ;;  %v3371_v43 = vld [vmem:[%s5971_s4 + $0x378] sm:$0xff] }
 0x194   :  { %1421 = vmatpush1.msra.mxu1 %v1220_v10  ;;  %v3370_v10 = vld [vmem:[%s5971_s4 + $0x370] sm:$0xff] }
 0x195   :  { %1666 = vmatprep.subr.mxu1 %v3387_v11  ;;  %v3369_v11 = vld [vmem:[%s5971_s4 + $0x368] sm:$0xff] }
 0x225   :  { %v3690_v3 = vpop.f32.mrf.mxu1 }
 0x227   :  { %v1095_v45 = vpop.f32.mrf.mxu1 }
 0x229   :  { %v3693_v47 = vpop.f32.mrf.mxu1 }
 0x22b   :  { %v1105_v14 = vpop.f32.mrf.mxu1 }
 0x235   :  { %v3712_v26 = vpop.f32.mrf.mxu1 }
 0x236   :  { %v5089_v50 = vmax.f32 %v3690_v3, %v3712_v26  ;;  %v3367_v3 = vld [vmem:[%s5971_s4 + $0x358] sm:$0xff]  ;;  %v3365_v26 = vld [vmem:[%s5971_s4 + $0x348] sm:$0xff] }
 0x237   :  { %v1197_v51 = vpop.f32.mrf.mxu1 }
 0x238   :  { %v5091_v6 = vmax.f32 %v1095_v45, %v1197_v51  ;;  %v1291_v30 = vrot.slane %v5089_v50, 1  ;;  %v1798_v52 = vrot.slane %v5089_v50, 4  ;;  %v3338_v45 = vld [vmem:[%s5971_s4 + $0x270] sm:$0xff]  ;;  %v3336_v51 = vld [vmem:[%s5971_s4 + $0x260] sm:$0xff] }
 0x239   :  { %v3715_v41 = vpop.f32.mrf.mxu1 }
 0x23a   :  { %1455 = vmatmul.mubr.f32.vlgmr.msra.gmra.mxu1 %v5091_v6  ;;  %v1290_v9 = vrot.slane %v5091_v6, 1  ;;  %v1797_v23 = vrot.slane %v5091_v6, 4  ;;  %v5114_v13 = vmax.f32 %v3693_v47, %v3715_v41  ;;  %v3366_v47 = vld [vmem:[%s5971_s4 + $0x350] sm:$0xff]  ;;  %v3335_v41 = vld [vmem:[%s5971_s4 + $0x258] sm:$0xff] }
 0x23b   :  { %1667 = vmatpush1.msra.mxu1 %v3386_v7  ;;  %v1207_v0 = vpop.f32.mrf.mxu1  ;;  %1460 = vmatprep.mubr.f32.mxu1 %v5985_v12  ;;  %v3364_v7 = vld [vmem:[%s5971_s4 + $0x340] sm:$0xff] }
 0x23c   :  { %v5116_v61 = vmax.f32 %v1105_v14, %v1207_v0  ;;  %1668 = vmatprep.subr.mxu1 %v3385_v15  ;;  %v1292_v46 = vsel %vm1289_vm2, %v1290_v9, %v1291_v30  ;;  %v5129_v16 = vsel %vm1796_vm3, %v1797_v23, %v1798_v52  ;;  %v1802_v39 = vrot.slane %v5114_v13, 4  ;;  %v3337_v14 = vld [vmem:[%s5971_s4 + $0x268] sm:$0xff]  ;;  %v3363_v15 = vld [vmem:[%s5971_s4 + $0x338] sm:$0xff]  ;;  %v3362_v9 = vld [vmem:[%s5971_s4 + $0x330] sm:$0xff] }
 0x23d   :  { %1669 = vmatpush1.msra.mxu1 %v3384_v49  ;;  %1366 = vmatmul.mubr.f32.vlgmr.msra.gmra.mxu0 %v1292_v46  ;;  %v1295_v22 = vrot.slane %v5114_v13, 1  ;;  %v3334_v49 = vld [vmem:[%s5971_s4 + $0x250] sm:$0xff]  ;;  %v3361_v0 = vld [vmem:[%s5971_s4 + $0x328] sm:$0xff]  ;;  %v3331_v23 = vld [vmem:[%s5971_s4 + $0x238] sm:$0xff] }
 0x23e   :  { %1525 = vmatpush1.msra.mxu0 %v3354_v34  ;;  %1670 = vmatprep.subr.mxu1 %v3383_v18  ;;  %v1293_v62 = vrot.slane %v5116_v61, 1  ;;  %v1800_v35 = vrot.slane %v5116_v61, 4  ;;  %v3332_v34 = vld [vmem:[%s5971_s4 + $0x240] sm:$0xff]  ;;  %v3330_v46 = vld [vmem:[%s5971_s4 + $0x230] sm:$0xff] }
 0x23f   :  { %1461 = vmatmul.mubr.f32.gmra.mxu1 %v5089_v50  ;;  %1526 = vmatprep.subr.mxu0 %v3353_v53  ;;  %v3360_v18 = vld [vmem:[%s5971_s4 + $0x320] sm:$0xff]  ;;  %v3358_v53 = vld [vmem:[%s5971_s4 + $0x310] sm:$0xff] }
 0x240   :  { %1671 = vmatpush1.msra.mxu1 %v3382_v33  ;;  %1527 = vmatpush1.msra.mxu0 %v3352_v36  ;;  %v1294_v55 = vsel %vm1289_vm2, %v1291_v30, %v1293_v62  ;;  %v5156_v63 = vsel %vm1796_vm3, %v1798_v52, %v1800_v35  ;;  %v5161_v1 = vsel %vm1796_vm3, %v1800_v35, %v1802_v39  ;;  %v3333_v30 = vld [vmem:[%s5971_s4 + $0x248] sm:$0xff]  ;;  %v3359_v52 = vld [vmem:[%s5971_s4 + $0x318] sm:$0xff]  ;;  %v1655_v35 = vrot.slane %v5091_v6, 3 }
 0x241   :  { %1672 = vmatprep.subr.mxu1 %v3381_v19  ;;  %1371 = vmatprep.mubr.f32.mxu0 %v5985_v12  ;;  %v1296_v4 = vsel %vm1289_vm2, %v1293_v62, %v1295_v22  ;;  %v3329_v33 = vld [vmem:[%s5971_s4 + $0x228] sm:$0xff]  ;;  %v3328_v19 = vld [vmem:[%s5971_s4 + $0x220] sm:$0xff] }
 0x242   :  { %1528 = vmatprep.subr.mxu0 %v3351_v37  ;;  %1673 = vmatpush1.msra.mxu1 %v3380_v54  ;;  %v3357_v36 = vld [vmem:[%s5971_s4 + $0x308] sm:$0xff]  ;;  %v3356_v62 = vld [vmem:[%s5971_s4 + $0x300] sm:$0xff]  ;;  %v3327_v37 = vld [vmem:[%s5971_s4 + $0x218] sm:$0xff] }
 0x243   :  { %1372 = vmatmul.mubr.f32.gmra.mxu0 %v1294_v55  ;;  %1466 = vmatprep.mubr.f32.mxu1 %v5985_v12  ;;  %v3326_v54 = vld [vmem:[%s5971_s4 + $0x210] sm:$0xff]  ;;  %v1656_v55 = vrot.slane %v5089_v50, 3 }
 0x244   :  { %1529 = vmatpush1.msra.mxu0 %v3350_v40  ;;  %1674 = vmatprep.subr.mxu1 %v3379_v20  ;;  %v3325_v40 = vld [vmem:[%s5971_s4 + $0x208] sm:$0xff]  ;;  %v1513_v20 = vrot.slane %v5091_v6, 2  ;;  %v3419_v6 = vld [vmem:[%s5971_s4 + $0x4f8] sm:$0xff] }
 0x245   :  { %1467 = vmatmul.mubr.f32.gmra.mxu1 %v5116_v61  ;;  %1530 = vmatprep.subr.mxu0 %v3349_v21  ;;  %v1657_v21 = vsel %vm1654_vm4, %v1655_v35, %v1656_v55 }
 0x246   :  { %1675 = vmatpush1.msra.mxu1 %v3378_v29  ;;  %1531 = vmatpush1.msra.mxu0 %v3348_v32  ;;  %v3324_v29 = vld [vmem:[%s5971_s4 + $0x200] sm:$0xff]  ;;  %v1658_v32 = vrot.slane %v5116_v61, 3 }
 0x247   :  { %1676 = vmatprep.subr.mxu1 %v3377_v25  ;;  %1377 = vmatprep.mubr.f32.mxu0 %v5985_v12  ;;  %v1514_v25 = vrot.slane %v5089_v50, 2  ;;  %v3417_v50 = vld [vmem:[%s5971_s4 + $0x4e8] sm:$0xff] }
 0x248   :  { %1532 = vmatprep.subr.mxu0 %v3347_v28  ;;  %1677 = vmatpush1.msra.mxu1 %v3376_v56  ;;  %v3418_v28 = vld [vmem:[%s5971_s4 + $0x4f0] sm:$0xff] }
 0x249   :  { %1378 = vmatmul.mubr.f32.gmra.mxu0 %v1296_v4  ;;  %1472 = vmatprep.mubr.f32.mxu1 %v5985_v12  ;;  %v1515_v56 = vsel %vm1512_vm5, %v1513_v20, %v1514_v25  ;;  %v3415_v4 = vld [vmem:[%s5971_s4 + $0x4d8] sm:$0xff] }
 0x24a   :  { %1533 = vmatpush1.msra.mxu0 %v3346_v24  ;;  %1678 = vmatprep.subr.mxu1 %v3375_v57  ;;  %v1659_v24 = vsel %vm1654_vm4, %v1656_v55, %v1658_v32  ;;  %v3416_v57 = vld [vmem:[%s5971_s4 + $0x4e0] sm:$0xff] }
 0x24b   :  { %1473 = vmatmul.mubr.f32.gmra.mxu1 %v5114_v13  ;;  %1534 = vmatprep.subr.mxu0 %v3345_v42  ;;  %v1660_v42 = vrot.slane %v5114_v13, 3 }
 0x24c   :  { %1679 = vmatpush1.msra.mxu1 %v3374_v38  ;;  %1535 = vmatpush1.msra.mxu0 %v3344_v48  ;;  %v3413_v48 = vld [vmem:[%s5971_s4 + $0x4c8] sm:$0xff] }
 0x24d   :  { %1680 = vmatprep.subr.mxu1 %v3373_v27  ;;  %1383 = vmatprep.mubr.f32.mxu0 %v5985_v12  ;;  %v1661_v27 = vsel %vm1654_vm4, %v1658_v32, %v1660_v42 }
 0x24e   :  { %1536 = vmatprep.subr.mxu0 %v3343_v58  ;;  %1681 = vmatpush1.msra.mxu1 %v3372_v59  ;;  %v3412_v58 = vld [vmem:[%s5971_s4 + $0x4c0] sm:$0xff]  ;;  %v1518_v59 = vrot.slane %v5114_v13, 2 }
 0x24f   :  { %1384 = vmatmul.mubr.f32.gmra.mxu0 %v1295_v22  ;;  %1682 = vmatprep.subr.mxu1 %v3371_v43  ;;  %v1516_v22 = vrot.slane %v5116_v61, 2  ;;  %v3414_v61 = vld [vmem:[%s5971_s4 + $0x4d0] sm:$0xff]  ;;  %v3411_v43 = vld [vmem:[%s5971_s4 + $0x4b8] sm:$0xff] }
 0x250   :  { %1537 = vmatpush1.msra.mxu0 %v3342_v60  ;;  %1683 = vmatpush1.msra.mxu1 %v3370_v10  ;;  %v3410_v60 = vld [vmem:[%s5971_s4 + $0x4b0] sm:$0xff] }
 0x251   :  { %1538 = vmatprep.subr.mxu0 %v3341_v31  ;;  %1684 = vmatprep.subr.mxu1 %v3369_v11  ;;  %v1517_v38 = vsel %vm1512_vm5, %v1514_v25, %v1516_v22  ;;  %v1519_v10 = vsel %vm1512_vm5, %v1516_v22, %v1518_v59  ;;  %v3409_v31 = vld [vmem:[%s5971_s4 + $0x4a8] sm:$0xff]  ;;  %v3408_v11 = vld [vmem:[%s5971_s4 + $0x4a0] sm:$0xff] }
 0x252   :  { %1539 = vmatpush1.msra.mxu0 %v3340_v5  ;;  %1685 = vmatpush1.msra.mxu1 %v3368_v17  ;;  %v3407_v5 = vld [vmem:[%s5971_s4 + $0x498] sm:$0xff]  ;;  %v3406_v17 = vld [vmem:[%s5971_s4 + $0x490] sm:$0xff] }
 0x253   :  { %1540 = vmatprep.subr.mxu0 %v3339_v2  ;;  %1686 = vmatprep.subr.mxu1 %v3367_v3  ;;  %v3405_v2 = vld [vmem:[%s5971_s4 + $0x488] sm:$0xff]  ;;  %v3404_v3 = vld [vmem:[%s5971_s4 + $0x480] sm:$0xff] }
 0x254   :  { %1541 = vmatpush1.msra.mxu0 %v3338_v45  ;;  %1687 = vmatpush1.msra.mxu1 %v3366_v47  ;;  %v3403_v45 = vld [vmem:[%s5971_s4 + $0x478] sm:$0xff]  ;;  %v3402_v47 = vld [vmem:[%s5971_s4 + $0x470] sm:$0xff] }
 0x255   :  { %1542 = vmatprep.subr.mxu0 %v3337_v14  ;;  %1688 = vmatprep.subr.mxu1 %v3365_v26  ;;  %v3401_v14 = vld [vmem:[%s5971_s4 + $0x468] sm:$0xff]  ;;  %v3400_v26 = vld [vmem:[%s5971_s4 + $0x460] sm:$0xff] }
 0x256   :  { %1543 = vmatpush1.msra.mxu0 %v3336_v51  ;;  %1689 = vmatpush1.msra.mxu1 %v3364_v7  ;;  %v3399_v51 = vld [vmem:[%s5971_s4 + $0x458] sm:$0xff]  ;;  %v3398_v7 = vld [vmem:[%s5971_s4 + $0x450] sm:$0xff] }
 0x257   :  { %1544 = vmatprep.subr.mxu0 %v3335_v41  ;;  %1690 = vmatprep.subr.mxu1 %v3363_v15  ;;  %v3397_v41 = vld [vmem:[%s5971_s4 + $0x448] sm:$0xff]  ;;  %v3396_v15 = vld [vmem:[%s5971_s4 + $0x440] sm:$0xff] }
 0x258   :  { %1545 = vmatpush1.msra.mxu0 %v3334_v49  ;;  %1691 = vmatpush1.msra.mxu1 %v3362_v9  ;;  %v3395_v49 = vld [vmem:[%s5971_s4 + $0x438] sm:$0xff]  ;;  %v3394_v9 = vld [vmem:[%s5971_s4 + $0x430] sm:$0xff] }
 0x259   :  { %1546 = vmatprep.subr.mxu0 %v3333_v30  ;;  %1692 = vmatprep.subr.mxu1 %v3361_v0  ;;  %v3393_v30 = vld [vmem:[%s5971_s4 + $0x428] sm:$0xff]  ;;  %v3392_v0 = vld [vmem:[%s5971_s4 + $0x420] sm:$0xff] }
 0x25a   :  { %1547 = vmatpush1.msra.mxu0 %v3332_v34  ;;  %1693 = vmatpush1.msra.mxu1 %v3360_v18  ;;  %v3391_v34 = vld [vmem:[%s5971_s4 + $0x418] sm:$0xff]  ;;  %v3390_v18 = vld [vmem:[%s5971_s4 + $0x410] sm:$0xff] }
 0x25b   :  { %1548 = vmatprep.subr.mxu0 %v3331_v23  ;;  %1694 = vmatprep.subr.mxu1 %v3359_v52  ;;  %v3389_v23 = vld [vmem:[%s5971_s4 + $0x408] sm:$0xff]  ;;  %v3388_v52 = vld [vmem:[%s5971_s4 + $0x400] sm:$0xff] }
 0x25c   :  { %1549 = vmatpush1.msra.mxu0 %v3330_v46  ;;  %1695 = vmatpush1.msra.mxu1 %v3358_v53  ;;  %v1937_v46 = vld [vmem:[%s5973_s6] sm:$0xff] }
 0x25d   :  { %1550 = vmatprep.subr.mxu0 %v3329_v33  ;;  %1696 = vmatprep.subr.mxu1 %v3357_v36 }
 0x25e   :  { %1551 = vmatpush1.msra.mxu0 %v3328_v19  ;;  %1697 = vmatpush1.msra.mxu1 %v3356_v62 }
 0x25f   :  { %1552 = vmatprep.subr.mxu0 %v3327_v37  ;;  %1730 = vmatprep.mubr.f32.mxu1 %v5985_v12 }
 0x260   :  { %1553 = vmatpush1.msra.mxu0 %v3326_v54  ;;  %1731 = vmatmul.mubr.f32.vlgmr.msra.gmra.mxu1 %v1657_v21 }
 0x261   :  { %1554 = vmatprep.subr.mxu0 %v3325_v40  ;;  %1588 = vmatprep.mubr.f32.mxu0 %v5985_v12 }
 0x262   :  { %1555 = vmatpush1.msra.mxu0 %v3324_v29  ;;  %1736 = vmatprep.mubr.f32.mxu1 %v5985_v12 }
 0x263   :  { %1589 = vmatmul.mubr.f32.vlgmr.msra.gmra.mxu0 %v1515_v56  ;;  %1808 = vmatprep.subr.mxu0 %v3419_v6 }
 0x264   :  { %1737 = vmatmul.mubr.f32.gmra.mxu1 %v1659_v24  ;;  %1809 = vmatpush1.msra.mxu0 %v3418_v28 }
 0x265   :  { %1810 = vmatprep.subr.mxu0 %v3417_v50  ;;  %1594 = vmatprep.mubr.f32.mxu0 %v5985_v12 }
 0x266   :  { %1811 = vmatpush1.msra.mxu0 %v3416_v57  ;;  %1742 = vmatprep.mubr.f32.mxu1 %v5985_v12 }
 0x267   :  { %1595 = vmatmul.mubr.f32.gmra.mxu0 %v1517_v38  ;;  %1812 = vmatprep.subr.mxu0 %v3415_v4 }
 0x268   :  { %1743 = vmatmul.mubr.f32.gmra.mxu1 %v1661_v27  ;;  %1813 = vmatpush1.msra.mxu0 %v3414_v61 }
 0x269   :  { %1814 = vmatprep.subr.mxu0 %v3413_v48  ;;  %1600 = vmatprep.mubr.f32.mxu0 %v5985_v12 }
 0x26a   :  { %1815 = vmatpush1.msra.mxu0 %v3412_v58  ;;  %1748 = vmatprep.mubr.f32.mxu1 %v5985_v12 }
 0x26b   :  { %1601 = vmatmul.mubr.f32.gmra.mxu0 %v1519_v10  ;;  %1816 = vmatprep.subr.mxu0 %v3411_v43 }
 0x26c   :  { %1749 = vmatmul.mubr.f32.gmra.mxu1 %v1660_v42  ;;  %1817 = vmatpush1.msra.mxu0 %v3410_v60 }
 0x26d   :  { %1818 = vmatprep.subr.mxu0 %v3409_v31  ;;  %1606 = vmatprep.mubr.f32.mxu0 %v5985_v12 }
 0x26e   :  { %1819 = vmatpush1.msra.mxu0 %v3408_v11 }
 0x26f   :  { %1607 = vmatmul.mubr.f32.gmra.mxu0 %v1518_v59  ;;  %1820 = vmatprep.subr.mxu0 %v3407_v5 }
 0x270   :  { %1821 = vmatpush1.msra.mxu0 %v3406_v17  ;;  %1872 = vmatprep.mubr.f32.mxu0 %v5985_v12 }
 0x271   :  { %1822 = vmatprep.subr.mxu0 %v3405_v2 }
 0x272   :  { %1823 = vmatpush1.msra.mxu0 %v3404_v3 }
 0x273   :  { %1824 = vmatprep.subr.mxu0 %v3403_v45 }
 0x274   :  { %1825 = vmatpush1.msra.mxu0 %v3402_v47 }
 0x275   :  { %1826 = vmatprep.subr.mxu0 %v3401_v14 }
 0x276   :  { %1827 = vmatpush1.msra.mxu0 %v3400_v26 }
 0x277   :  { %1828 = vmatprep.subr.mxu0 %v3399_v51 }
 0x278   :  { %1829 = vmatpush1.msra.mxu0 %v3398_v7 }
 0x279   :  { %1830 = vmatprep.subr.mxu0 %v3397_v41 }
 0x27a   :  { %1831 = vmatpush1.msra.mxu0 %v3396_v15 }
 0x27b   :  { %1832 = vmatprep.subr.mxu0 %v3395_v49  ;;  %v1905_v49 = vld [vmem:[%s5972_s5] sm:$0x3] }
 0x27c   :  { %1833 = vmatpush1.msra.mxu0 %v3394_v9 }
 0x27d   :  { %1834 = vmatprep.subr.mxu0 %v3393_v30 }
 0x27e   :  { %1835 = vmatpush1.msra.mxu0 %v3392_v0 }
 0x27f   :  { %1836 = vmatprep.subr.mxu0 %v3391_v34 }
 0x280   :  { %1837 = vmatpush1.msra.mxu0 %v3390_v18 }
 0x281   :  { %1838 = vmatprep.subr.mxu0 %v3389_v23 }
 0x282   :  { %1839 = vmatpush1.msra.mxu0 %v3388_v52 }
 0x283   :  { %1873 = vmatmul.mubr.f32.vlgmr.msra.gmra.mxu0 %v5129_v16  ;;  %v3423_v16 = vld [vmem:[%s5973_s6 + $0x10] sm:$0xff] }
 0x284   :  { %1878 = vmatprep.mubr.f32.mxu0 %v5985_v12  ;;  %3735 = vmatprep.mubr.msk.f32.mxu1 %vm1939_vm6, %v3423_v16  ;;  %v5986_v16 = vsub.s32 0, %v4814_v44 }
 0x287   :  { %1879 = vmatmul.mubr.f32.gmra.mxu0 %v5156_v63 }
 0x288   :  { %1884 = vmatprep.mubr.f32.mxu0 %v5985_v12 }
 0x28b   :  { %1885 = vmatmul.mubr.f32.gmra.mxu0 %v5161_v1 }
 0x28c   :  { %1890 = vmatprep.mubr.f32.mxu0 %v5985_v12 }
 0x28f   :  { %1891 = vmatmul.mubr.f32.gmra.mxu0 %v1802_v39 }
 0x290   :  { %3724 = vmatprep.mubr.msk.f32.mxu0 %vm1939_vm6, %v1937_v46 }
 0x2fa   :  { %v1456_v36 = vpop.f32.mrf.mxu1 }
 0x2fc   :  { %v1458_v39 = vpop.f32.mrf.mxu1 }
 0x2fd   :  { %v1367_v63 = vpop.f32.mrf.mxu0 }
 0x2fe   :  { %v1457_v14 = vadd.f32 %v1456_v36, %v1367_v63  ;;  %v1910_v63 = vrot.slane %v1905_v49, %v5986_v16  ;;  %v2201_v16 = vld [vmem:[%s5975_s8 + $0x60] sm:$0xff] }
 0x2ff   :  { %v1369_v1 = vpop.f32.mrf.mxu0  ;;  %v1462_v62 = vpop.f32.mrf.mxu1 }
 0x300   :  { %v1459_v11 = vadd.f32 %v1458_v39, %v1369_v1 }
 0x301   :  { %v1464_v37 = vpop.f32.mrf.mxu1 }
 0x303   :  { %v1373_v53 = vpop.f32.mrf.mxu0 }
 0x304   :  { %v1463_v5 = vadd.f32 %v1462_v62, %v1373_v53  ;;  %v1914_v53 = vrot.slane %v1905_v49, %v968_v8 }
 0x305   :  { %v1375_v33 = vpop.f32.mrf.mxu0  ;;  %v1468_v55 = vpop.f32.mrf.mxu1 }
 0x306   :  { %v1465_v43 = vadd.f32 %v1464_v37, %v1375_v33 }
 0x307   :  { %v1470_v20 = vpop.f32.mrf.mxu1 }
 0x309   :  { %v1379_v13 = vpop.f32.mrf.mxu0 }
 0x30a   :  { %v1469_v60 = vadd.f32 %v1468_v55, %v1379_v13 }
 0x30b   :  { %v1381_v19 = vpop.f32.mrf.mxu0  ;;  %v1474_v29 = vpop.f32.mrf.mxu1 }
 0x30c   :  { %v1471_v27 = vadd.f32 %v1470_v20, %v1381_v19 }
 0x30d   :  { %v1476_v25 = vpop.f32.mrf.mxu1 }
 0x30f   :  { %v1385_v35 = vpop.f32.mrf.mxu0 }
 0x310   :  { %v1475_v10 = vadd.f32 %v1474_v29, %v1385_v35 }
 0x311   :  { %v1387_v54 = vpop.f32.mrf.mxu0 }
 0x312   :  { %v1477_v2 = vadd.f32 %v1476_v25, %v1387_v54 }
 0x320   :  { %v1732_v28 = vpop.f32.mrf.mxu1 }
 0x322   :  { %v1734_v50 = vpop.f32.mrf.mxu1 }
 0x323   :  { %v1590_v40 = vpop.f32.mrf.mxu0 }
 0x324   :  { %v1738_v24 = vpop.f32.mrf.mxu1  ;;  %v1613_v30 = vadd.f32 %v1590_v40, %v1457_v14  ;;  %v3437_v14 = vld [vmem:[%s5975_s8 + $0xa8] sm:$0xff] }
 0x325   :  { %v1592_v21 = vpop.f32.mrf.mxu0 }
 0x326   :  { %v1740_v4 = vpop.f32.mrf.mxu1  ;;  %v1614_v26 = vadd.f32 %v1592_v21, %v1459_v11  ;;  %v1755_v35 = vadd.f32 %v1732_v28, %v1613_v30  ;;  %v3444_v11 = vld [vmem:[%s5975_s8 + $0xe0] sm:$0xff] }
 0x327   :  { %v1596_v32 = vpop.f32.mrf.mxu0 }
 0x328   :  { %v1744_v61 = vpop.f32.mrf.mxu1  ;;  %v1615_v51 = vadd.f32 %v1596_v32, %v1463_v5  ;;  %v1756_v1 = vadd.f32 %v1734_v50, %v1614_v26  ;;  %v3443_v5 = vld [vmem:[%s5975_s8 + $0xd8] sm:$0xff]  ;;  %v3436_v26 = vld [vmem:[%s5975_s8 + $0xa0] sm:$0xff] }
 0x329   :  { %v1598_v6 = vpop.f32.mrf.mxu0 }
 0x32a   :  { %v1746_v58 = vpop.f32.mrf.mxu1  ;;  %v1616_v3 = vadd.f32 %v1598_v6, %v1465_v43  ;;  %v1757_v33 = vadd.f32 %v1738_v24, %v1615_v51  ;;  %v3424_v43 = vld [vmem:[%s5973_s6 + $0x18] sm:$0x3] }
 0x32b   :  { %v1602_v56 = vpop.f32.mrf.mxu0  ;;  %v3435_v51 = vld [vmem:[%s5975_s8 + $0x98] sm:$0xff] }
 0x32c   :  { %v1617_v45 = vadd.f32 %v1602_v56, %v1469_v60  ;;  %v1750_v7 = vpop.f32.mrf.mxu1  ;;  %v1758_v34 = vadd.f32 %v1740_v4, %v1616_v3  ;;  %v3447_v60 = vld [vmem:[%s5975_s8 + $0xf8] sm:$0xff]  ;;  %v3440_v3 = vld [vmem:[%s5975_s8 + $0xc0] sm:$0xff] }
 0x32d   :  { %v1604_v22 = vpop.f32.mrf.mxu0 }
 0x32e   :  { %v1618_v31 = vadd.f32 %v1604_v22, %v1471_v27  ;;  %v1759_v18 = vadd.f32 %v1744_v61, %v1617_v45  ;;  %v1752_v46 = vpop.f32.mrf.mxu1  ;;  %v3439_v45 = vld [vmem:[%s5975_s8 + $0xb8] sm:$0xff] }
 0x32f   :  { %v1608_v57 = vpop.f32.mrf.mxu0 }
 0x330   :  { %v1619_v47 = vadd.f32 %v1608_v57, %v1475_v10  ;;  %v1760_v9 = vadd.f32 %v1746_v58, %v1618_v31  ;;  %v3446_v10 = vld [vmem:[%s5975_s8 + $0xf0] sm:$0xff]  ;;  %v3445_v31 = vld [vmem:[%s5975_s8 + $0xe8] sm:$0xff] }
 0x331   :  { %v1610_v42 = vpop.f32.mrf.mxu0 }
 0x332   :  { %v1620_v15 = vadd.f32 %v1610_v42, %v1477_v2  ;;  %v1761_v52 = vadd.f32 %v1750_v7, %v1619_v47  ;;  %v3441_v2 = vld [vmem:[%s5975_s8 + $0xc8] sm:$0xff]  ;;  %v3438_v47 = vld [vmem:[%s5975_s8 + $0xb0] sm:$0xff] }
 0x333   :  { %v3434_v7 = vld [vmem:[%s5975_s8 + $0x90] sm:$0xff] }
 0x334   :  { %v1762_v62 = vadd.f32 %v1752_v46, %v1620_v15  ;;  %v2202_v46 = vld [vmem:[%s5975_s8 + $0x68] sm:$0xff] }
 0x343   :  { %v1874_v38 = vpop.f32.mrf.mxu0 }
 0x344   :  { %v1897_v29 = vadd.f32 %v1874_v38, %v1755_v35  ;;  %v2191_v35 = vld [vmem:[%s5975_s8 + $0x10] sm:$0xff] }
 0x345   :  { %v1876_v48 = vpop.f32.mrf.mxu0 }
 0x346   :  { %v1898_v37 = vadd.f32 %v1876_v48, %v1756_v1  ;;  %v1917_v24 = vadd.f32 %v1910_v63, %v1897_v29  ;;  %v2199_v1 = vld [vmem:[%s5975_s8 + $0x50] sm:$0xff] }
 0x347   :  { %v1880_v59 = vpop.f32.mrf.mxu0  ;;  %v3464_v29 = vld [vmem:[%s5975_s8 + $0x170] sm:$0xff] }
 0x348   :  { %v1899_v55 = vadd.f32 %v1880_v59, %v1757_v33  ;;  %v1918_v56 = vadd.f32 %v1914_v53, %v1898_v37  ;;  %v1925_v38 = vmax.f32 %v1917_v24, 0.0  ;;  %v1938_v59 = vld [vmem:[%s5973_s6 + $0x8] sm:$0x3]  ;;  %v2197_v33 = vld [vmem:[%s5975_s8 + $0x40] sm:$0xff]  ;;  %v3461_v24 = vld [vmem:[%s5975_s8 + $0x158] sm:$0xff] }
 0x349   :  { %v1882_v17 = vpop.f32.mrf.mxu0  ;;  %v2190_v37 = vld [vmem:[%s5975_s8 + $0x8] sm:$0xff] }
 0x34a   :  { %v1900_v13 = vadd.f32 %v1882_v17, %v1758_v34  ;;  %v1919_v44 = vadd.f32 %v1910_v63, %v1899_v55  ;;  %v1926_v28 = vmax.f32 %v1918_v56, 0.0  ;;  %v3442_v17 = vld [vmem:[%s5975_s8 + $0xd0] sm:$0xff]  ;;  %v2110_v34 = vld [vmem:[#allocation2] sm:$0x3]  ;;  %v2438_v56 = vld [vmem:[#allocation2 + $0x4] sm:$0x3] }
 0x34b   :  { %v1886_v41 = vpop.f32.mrf.mxu0  ;;  %v2189_v55 = vld [vmem:[%s5975_s8] sm:$0xff] }
 0x34c   :  { %v1901_v39 = vadd.f32 %v1886_v41, %v1759_v18  ;;  %v1920_v32 = vadd.f32 %v1914_v53, %v1900_v13  ;;  %v1927_v61 = vmax.f32 %v1919_v44, 0.0  ;;  %v1933_v58 = vmax.f32 %v1925_v38, %v1926_v28  ;;  %v2206_v18 = vld [vmem:[#allocation2 + $0x2] sm:$0x3]  ;;  %v2195_v13 = vld [vmem:[%s5975_s8 + $0x30] sm:$0xff]  ;;  %v3459_v28 = vld [vmem:[%s5975_s8 + $0x148] sm:$0xff] }
 0x34d   :  { %v1888_v0 = vpop.f32.mrf.mxu0  ;;  %v3479_v38 = vld [vmem:[%s5975_s8 + $0x1d8] sm:$0xff] }
 0x34e   :  { %v1902_v23 = vadd.f32 %v1888_v0, %v1760_v9  ;;  %v1921_v25 = vadd.f32 %v1910_v63, %v1901_v39  ;;  %v1928_v57 = vmax.f32 %v1920_v32, 0.0  ;;  %v2194_v39 = vld [vmem:[%s5975_s8 + $0x28] sm:$0xff] }
 0x34f   :  { %v1892_v36 = vpop.f32.mrf.mxu0 }
 0x350   :  { %v1903_v19 = vadd.f32 %v1892_v36, %v1761_v52  ;;  %v1922_v40 = vadd.f32 %v1914_v53, %v1902_v23  ;;  %v1929_v4 = vmax.f32 %v1921_v25, 0.0  ;;  %v1934_v27 = vmax.f32 %v1927_v61, %v1928_v57  ;;  %v2204_v23 = vld [vmem:[%s5975_s8 + $0x78] sm:$0xff]  ;;  %v2203_v52 = vld [vmem:[%s5975_s8 + $0x70] sm:$0xff]  ;;  %v3480_v61 = vld [vmem:[%s5975_s8 + $0x1e0] sm:$0xff] }
 0x351   :  { %v1894_v54 = vpop.f32.mrf.mxu0  ;;  %v2196_v36 = vld [vmem:[%s5975_s8 + $0x38] sm:$0xff]  ;;  %v3482_v57 = vld [vmem:[%s5975_s8 + $0x1f0] sm:$0xff] }
 0x352   :  { %v1923_v20 = vadd.f32 %v1910_v63, %v1903_v19  ;;  %v1904_v21 = vadd.f32 %v1894_v54, %v1762_v62  ;;  %v1930_v8 = vmax.f32 %v1922_v40, 0.0  ;;  %v2200_v63 = vld [vmem:[%s5975_s8 + $0x58] sm:$0xff]  ;;  %v2193_v19 = vld [vmem:[%s5975_s8 + $0x20] sm:$0xff]  ;;  %v3433_v54 = vld [vmem:[%s5975_s8 + $0x88] sm:$0xff] }
 0x353   :  { %v2192_v62 = vld [vmem:[%s5975_s8 + $0x18] sm:$0xff]  ;;  %v3432_v40 = vld [vmem:[%s5975_s8 + $0x80] sm:$0xff] }
 0x354   :  { %v1924_v6 = vadd.f32 %v1914_v53, %v1904_v21  ;;  %v1931_v50 = vmax.f32 %v1923_v20, 0.0  ;;  %v1935_v48 = vmax.f32 %v1929_v4, %v1930_v8  ;;  %v2198_v53 = vld [vmem:[%s5975_s8 + $0x48] sm:$0xff]  ;;  %v3465_v20 = vld [vmem:[%s5975_s8 + $0x178] sm:$0xff]  ;;  %v3462_v8 = vld [vmem:[%s5975_s8 + $0x160] sm:$0xff] }
 0x355   :  { %v3460_v4 = vld [vmem:[%s5975_s8 + $0x150] sm:$0xff] }
 0x356   :  { %v1932_v22 = vmax.f32 %v1924_v6, 0.0  ;;  %v3463_v6 = vld [vmem:[%s5975_s8 + $0x168] sm:$0xff] }
 0x358   :  { %v1936_v42 = vmax.f32 %v1931_v50, %v1932_v22  ;;  %v2601_v50 = vld [vmem:[#allocation2 + $0x6] sm:$0x3]  ;;  %v3483_v22 = vld [vmem:[%s5975_s8 + $0x1f8] sm:$0xff] }
 0x35a   :  { %3716 = vmatprep.subr.msk.mxu0 %vm1796_vm3, %v1936_v42  ;;  %3727 = vmatprep.subr.msk.mxu1 %vm1796_vm3, %v1936_v42 }
 0x35b   :  { %3717 = vmatpush3.msk.msra.mxu0 %vm1796_vm3, %v1936_v42  ;;  %3728 = vmatpush3.msk.msra.mxu1 %vm1796_vm3, %v1936_v42  ;;  %v3481_v42 = vld [vmem:[%s5975_s8 + $0x1e8] sm:$0xff] }
 0x35c   :  { %3718 = vmatprep.subr.mxu0 %v1935_v48  ;;  %3729 = vmatprep.subr.mxu1 %v1935_v48 }
 0x35d   :  { %3719 = vmatpush3.msra.mxu0 %v1935_v48  ;;  %3730 = vmatpush3.msra.mxu1 %v1935_v48  ;;  %v3458_v48 = vld [vmem:[%s5975_s8 + $0x140] sm:$0xff] }
 0x35e   :  { %3720 = vmatprep.subr.mxu0 %v1934_v27  ;;  %3731 = vmatprep.subr.mxu1 %v1934_v27 }
 0x35f   :  { %3721 = vmatpush3.msra.mxu0 %v1934_v27  ;;  %3732 = vmatpush3.msra.mxu1 %v1934_v27  ;;  %v3457_v27 = vld [vmem:[%s5975_s8 + $0x138] sm:$0xff] }
 0x360   :  { %3722 = vmatprep.subr.mxu0 %v1933_v58  ;;  %3733 = vmatprep.subr.mxu1 %v1933_v58 }
 0x361   :  { %3723 = vmatpush3.msra.mxu0 %v1933_v58  ;;  %3734 = vmatpush3.msra.mxu1 %v1933_v58  ;;  %v3478_v58 = vld [vmem:[%s5975_s8 + $0x1d0] sm:$0xff] }
 0x362   :  { %3725 = vmatmul.mubr.msk.f32.vlgmr.msra.gmra.mxu0 %vm1939_vm6, %v1938_v59  ;;  %3736 = vmatmul.mubr.msk.f32.vlgmr.msra.gmra.mxu1 %vm1939_vm6, %v3424_v43  ;;  %v3456_v59 = vld [vmem:[%s5975_s8 + $0x130] sm:$0xff]  ;;  %v3477_v43 = vld [vmem:[%s5975_s8 + $0x1c8] sm:$0xff] }
 0x363   :  { %3738 = vmatprep.subr.mxu0 %v5985_v12  ;;  %3752 = vmatprep.subr.mxu1 %v5985_v12 }
 0x364   :  { %3742 = vmatprep.mubr.msk.f32.mxu0 %vm4060_vm7, %v5985_v12  ;;  %3784 = vmatprep.mubr.msk.f32.mxu1 %vm4060_vm7, %v5985_v12 }
 0x365   :  { %3753 = vmatpush3.msra.mxu1 %v3447_v60  ;;  %v3455_v60 = vld [vmem:[%s5975_s8 + $0x128] sm:$0xff] }
 0x366   :  { %3754 = vmatprep.subr.mxu1 %v5985_v12 }
 0x367   :  { %3755 = vmatpush3.msra.mxu1 %v3446_v10  ;;  %v3476_v10 = vld [vmem:[%s5975_s8 + $0x1c0] sm:$0xff] }
 0x368   :  { %3756 = vmatprep.subr.mxu1 %v5985_v12 }
 0x369   :  { %3757 = vmatpush3.msra.mxu1 %v3445_v31  ;;  %v3454_v31 = vld [vmem:[%s5975_s8 + $0x120] sm:$0xff] }
 0x36a   :  { %3758 = vmatprep.subr.mxu1 %v5985_v12 }
 0x36b   :  { %3759 = vmatpush3.msra.mxu1 %v3444_v11  ;;  %v3475_v11 = vld [vmem:[%s5975_s8 + $0x1b8] sm:$0xff] }
 0x36c   :  { %3760 = vmatprep.subr.mxu1 %v5985_v12 }
 0x36d   :  { %3761 = vmatpush3.msra.mxu1 %v3443_v5  ;;  %v3453_v5 = vld [vmem:[%s5975_s8 + $0x118] sm:$0xff] }
 0x36e   :  { %3762 = vmatprep.subr.mxu1 %v5985_v12 }
 0x36f   :  { %3763 = vmatpush3.msra.mxu1 %v3442_v17  ;;  %v3474_v17 = vld [vmem:[%s5975_s8 + $0x1b0] sm:$0xff] }
 0x370   :  { %3764 = vmatprep.subr.mxu1 %v5985_v12 }
 0x371   :  { %3765 = vmatpush3.msra.mxu1 %v3441_v2  ;;  %v3452_v2 = vld [vmem:[%s5975_s8 + $0x110] sm:$0xff] }
 0x372   :  { %3766 = vmatprep.subr.mxu1 %v5985_v12 }
 0x373   :  { %3767 = vmatpush3.msra.mxu1 %v3440_v3  ;;  %v3473_v3 = vld [vmem:[%s5975_s8 + $0x1a8] sm:$0xff] }
 0x374   :  { %3768 = vmatprep.subr.mxu1 %v5985_v12 }
 0x375   :  { %3769 = vmatpush3.msra.mxu1 %v3439_v45  ;;  %v3472_v45 = vld [vmem:[%s5975_s8 + $0x1a0] sm:$0xff] }
 0x376   :  { %3770 = vmatprep.subr.mxu1 %v5985_v12 }
 0x377   :  { %3771 = vmatpush3.msra.mxu1 %v3438_v47  ;;  %v3451_v47 = vld [vmem:[%s5975_s8 + $0x108] sm:$0xff] }
 0x378   :  { %3772 = vmatprep.subr.mxu1 %v5985_v12 }
 0x379   :  { %3773 = vmatpush3.msra.mxu1 %v3437_v14  ;;  %v3471_v14 = vld [vmem:[%s5975_s8 + $0x198] sm:$0xff] }
 0x37a   :  { %3774 = vmatprep.subr.mxu1 %v5985_v12 }
 0x37b   :  { %3775 = vmatpush3.msra.mxu1 %v3436_v26  ;;  %v3450_v26 = vld [vmem:[%s5975_s8 + $0x100] sm:$0xff] }
 0x37c   :  { %3776 = vmatprep.subr.mxu1 %v5985_v12 }
 0x37d   :  { %3777 = vmatpush3.msra.mxu1 %v3435_v51  ;;  %v3470_v51 = vld [vmem:[%s5975_s8 + $0x190] sm:$0xff] }
 0x37e   :  { %3778 = vmatprep.subr.mxu1 %v5985_v12 }
 0x37f   :  { %3779 = vmatpush3.msra.mxu1 %v3434_v7  ;;  %v3469_v7 = vld [vmem:[%s5975_s8 + $0x188] sm:$0xff] }
 0x380   :  { %3780 = vmatprep.subr.mxu1 %v5985_v12 }
 0x381   :  { %3781 = vmatpush3.msra.mxu1 %v3433_v54  ;;  %v3489_v54 = vld [vmem:[%s5975_s8 + $0x218] sm:$0xff] }
 0x382   :  { %3782 = vmatprep.subr.mxu1 %v5985_v12 }
 0x383   :  { %3783 = vmatpush3.msra.mxu1 %v3432_v40  ;;  %v3487_v40 = vld [vmem:[%s5975_s8 + $0x208] sm:$0xff] }
 0x384   :  { %3822 = vmatprep.subr.mxu1 %v5985_v12 }
 0x422   :  { %v3726_v41 = vpop.f32.mrf.mxu0  ;;  %v3737_v15 = vpop.f32.mrf.mxu1 }
 0x423   :  { %v5531_v49 = vmax.f32 %v3726_v41, %v3737_v15  ;;  %v3468_v41 = vld [vmem:[%s5975_s8 + $0x180] sm:$0xff] }
 0x424   :  { %v2015_v9 = vpop.f32.mrf.mxu0  ;;  %v2099_v30 = vpop.f32.mrf.mxu1 }
 0x425   :  { %v5533_v0 = vmax.f32 %v2015_v9, %v2099_v30  ;;  %3739 = vmatpush3.msk.msra.mxu0 %vm2115_vm8, %v5531_v49 }
 0x426   :  { %3740 = vmatprep.subr.mxu0 %v5985_v12 }
 0x427   :  { %3741 = vmatpush3.msra.mxu0 %v5533_v0 }
 0x428   :  { %3743 = vmatmul.mubr.msk.f32.vlgmr.msra.gmra.mxu0 %vm2111_vm9, %v2110_v34  ;;  %3745 = vmatprep.subr.mxu0 %v5985_v12 }
 0x429   :  { %3746 = vmatpush3.msk.msra.mxu0 %vm2115_vm8, %v5531_v49  ;;  %3749 = vmatprep.mubr.msk.f32.mxu0 %vm4060_vm7, %v5985_v12 }
 0x42a   :  { %3747 = vmatprep.subr.mxu0 %v5985_v12 }
 0x42b   :  { %3748 = vmatpush3.msra.mxu0 %v5533_v0 }
 0x42c   :  { %3750 = vmatmul.mubr.msk.f32.vlgmr.msra.gmra.mxu0 %vm2111_vm9, %v2206_v18  ;;  %3787 = vmatprep.subr.mxu0 %v5985_v12 }
 0x42d   :  { %3788 = vmatpush3.msra.mxu0 %v2204_v23  ;;  %3819 = vmatprep.mubr.msk.f32.mxu0 %vm4060_vm7, %v5985_v12 }
 0x42e   :  { %3789 = vmatprep.subr.mxu0 %v5985_v12 }
 0x42f   :  { %3790 = vmatpush3.msra.mxu0 %v2203_v52 }
 0x430   :  { %3791 = vmatprep.subr.mxu0 %v5985_v12 }
 0x431   :  { %3792 = vmatpush3.msra.mxu0 %v2202_v46  ;;  %v2764_v46 = vld [vmem:[#allocation2 + $0x8] sm:$0x3] }
 0x432   :  { %3793 = vmatprep.subr.mxu0 %v5985_v12 }
 0x433   :  { %3794 = vmatpush3.msra.mxu0 %v2201_v16 }
 0x434   :  { %3795 = vmatprep.subr.mxu0 %v5985_v12 }
 0x435   :  { %3796 = vmatpush3.msra.mxu0 %v2200_v63  ;;  %v3501_v63 = vld [vmem:[%s5975_s8 + $0x278] sm:$0xff] }
 0x436   :  { %3797 = vmatprep.subr.mxu0 %v5985_v12 }
 0x437   :  { %3798 = vmatpush3.msra.mxu0 %v2199_v1 }
 0x438   :  { %3799 = vmatprep.subr.mxu0 %v5985_v12 }
 0x439   :  { %3800 = vmatpush3.msra.mxu0 %v2198_v53  ;;  %v3498_v53 = vld [vmem:[%s5975_s8 + $0x260] sm:$0xff] }
 0x43a   :  { %3801 = vmatprep.subr.mxu0 %v5985_v12 }
 0x43b   :  { %3802 = vmatpush3.msra.mxu0 %v2197_v33  ;;  %v3497_v33 = vld [vmem:[%s5975_s8 + $0x258] sm:$0xff] }
 0x43c   :  { %3803 = vmatprep.subr.mxu0 %v5985_v12 }
 0x43d   :  { %3804 = vmatpush3.msra.mxu0 %v2196_v36  ;;  %v3496_v36 = vld [vmem:[%s5975_s8 + $0x250] sm:$0xff] }
 0x43e   :  { %3805 = vmatprep.subr.mxu0 %v5985_v12 }
 0x43f   :  { %3806 = vmatpush3.msra.mxu0 %v2195_v13  ;;  %v3495_v13 = vld [vmem:[%s5975_s8 + $0x248] sm:$0xff] }
 0x440   :  { %3807 = vmatprep.subr.mxu0 %v5985_v12 }
 0x441   :  { %3808 = vmatpush3.msra.mxu0 %v2194_v39  ;;  %v3494_v39 = vld [vmem:[%s5975_s8 + $0x240] sm:$0xff] }
 0x442   :  { %3809 = vmatprep.subr.mxu0 %v5985_v12 }
 0x443   :  { %3810 = vmatpush3.msra.mxu0 %v2193_v19  ;;  %v3493_v19 = vld [vmem:[%s5975_s8 + $0x238] sm:$0xff] }
 0x444   :  { %3811 = vmatprep.subr.mxu0 %v5985_v12 }
 0x445   :  { %3812 = vmatpush3.msra.mxu0 %v2192_v62  ;;  %v3492_v62 = vld [vmem:[%s5975_s8 + $0x230] sm:$0xff] }
 0x446   :  { %3813 = vmatprep.subr.mxu0 %v5985_v12 }
 0x447   :  { %3814 = vmatpush3.msra.mxu0 %v2191_v35  ;;  %v3491_v35 = vld [vmem:[%s5975_s8 + $0x228] sm:$0xff] }
 0x448   :  { %3815 = vmatprep.subr.mxu0 %v5985_v12 }
 0x449   :  { %3816 = vmatpush3.msra.mxu0 %v2190_v37  ;;  %v3490_v37 = vld [vmem:[%s5975_s8 + $0x220] sm:$0xff] }
 0x44a   :  { %3817 = vmatprep.subr.mxu0 %v5985_v12 }
 0x44b   :  { %3818 = vmatpush3.msra.mxu0 %v2189_v55  ;;  %v3488_v55 = vld [vmem:[%s5975_s8 + $0x210] sm:$0xff] }
 0x44c   :  { %3829 = vmatprep.subr.mxu0 %v5985_v12 }
 0x4e8   :  { %v2185_v21 = vpop.f32.mrf.mxu0 }
 0x4e9   :  { %3820 = vmatmul.mubr.f32.vlgmr.msra.gmra.mxu0 %v2185_v21  ;;  %v2949_v21 = vld [vmem:[%s5977_s10 + $0x70] sm:$0xff] }
 0x4ea   :  { %v3744_v32 = vpop.f32.mrf.mxu0  ;;  %3830 = vmatpush3.msra.mxu0 %v3465_v20  ;;  %3861 = vmatprep.mubr.msk.f32.mxu0 %vm4060_vm7, %v5985_v12  ;;  %v3486_v20 = vld [vmem:[%s5975_s8 + $0x200] sm:$0xff] }
 0x4eb   :  { %3831 = vmatprep.subr.mxu0 %v5985_v12  ;;  %v2947_v32 = vld [vmem:[%s5977_s10 + $0x60] sm:$0xff] }
 0x4ec   :  { %v2276_v25 = vpop.f32.mrf.mxu0  ;;  %3832 = vmatpush3.msra.mxu0 %v3464_v29  ;;  %v2948_v29 = vld [vmem:[%s5977_s10 + $0x68] sm:$0xff] }
 0x4ed   :  { %3785 = vmatmul.mubr.f32.vlgmr.msra.gmra.mxu1 %v2276_v25  ;;  %3833 = vmatprep.subr.mxu0 %v5985_v12  ;;  %v2946_v25 = vld [vmem:[%s5977_s10 + $0x58] sm:$0xff] }
 0x4ee   :  { %3823 = vmatpush3.msk.msra.mxu1 %vm2115_vm8, %v5531_v49  ;;  %3826 = vmatprep.mubr.msk.f32.mxu1 %vm4060_vm7, %v5985_v12  ;;  %v3751_v44 = vpop.f32.mrf.mxu0 }
 0x4ef   :  { %3824 = vmatprep.subr.mxu1 %v5985_v12  ;;  %3834 = vmatpush3.msra.mxu0 %v3463_v6  ;;  %v2945_v6 = vld [vmem:[%s5977_s10 + $0x50] sm:$0xff]  ;;  %v2943_v44 = vld [vmem:[%s5977_s10 + $0x40] sm:$0xff] }
 0x4f0   :  { %3825 = vmatpush3.msra.mxu1 %v5533_v0  ;;  %3835 = vmatprep.subr.mxu0 %v5985_v12 }
 0x4f1   :  { %3864 = vmatprep.subr.mxu1 %v5985_v12  ;;  %3827 = vmatmul.mubr.msk.f32.vlgmr.msra.gmra.mxu1 %vm2111_vm9, %v2438_v56  ;;  %v2944_v56 = vld [vmem:[%s5977_s10 + $0x48] sm:$0xff] }
 0x4f2   :  { %3865 = vmatpush3.msk.msra.mxu1 %vm2115_vm8, %v5531_v49  ;;  %3868 = vmatprep.mubr.msk.f32.mxu1 %vm4060_vm7, %v5985_v12 }
 0x4f3   :  { %3866 = vmatprep.subr.mxu1 %v5985_v12  ;;  %3836 = vmatpush3.msra.mxu0 %v3462_v8  ;;  %v2942_v8 = vld [vmem:[%s5977_s10 + $0x38] sm:$0xff] }
 0x4f4   :  { %3867 = vmatpush3.msra.mxu1 %v5533_v0  ;;  %3837 = vmatprep.subr.mxu0 %v5985_v12 }
 0x4f5   :  { %3869 = vmatmul.mubr.msk.f32.vlgmr.msra.gmra.mxu1 %vm2111_vm9, %v2601_v50  ;;  %3871 = vmatprep.subr.mxu1 %v5985_v12  ;;  %v2941_v50 = vld [vmem:[%s5977_s10 + $0x30] sm:$0xff] }
 0x4f6   :  { %3872 = vmatpush3.msra.mxu1 %v3483_v22  ;;  %3838 = vmatpush3.msra.mxu0 %v3461_v24  ;;  %v2940_v22 = vld [vmem:[%s5977_s10 + $0x28] sm:$0xff]  ;;  %v2939_v24 = vld [vmem:[%s5977_s10 + $0x20] sm:$0xff] }
 0x4f7   :  { %3873 = vmatprep.subr.mxu1 %v5985_v12  ;;  %3839 = vmatprep.subr.mxu0 %v5985_v12 }
 0x4f8   :  { %3874 = vmatpush3.msra.mxu1 %v3482_v57  ;;  %3840 = vmatpush3.msra.mxu0 %v3460_v4 }
 0x4f9   :  { %3875 = vmatprep.subr.mxu1 %v5985_v12  ;;  %3841 = vmatprep.subr.mxu0 %v5985_v12 }
 0x4fa   :  { %3876 = vmatpush3.msra.mxu1 %v3481_v42  ;;  %3842 = vmatpush3.msra.mxu0 %v3459_v28 }
 0x4fb   :  { %3877 = vmatprep.subr.mxu1 %v5985_v12  ;;  %3843 = vmatprep.subr.mxu0 %v5985_v12 }
 0x4fc   :  { %3878 = vmatpush3.msra.mxu1 %v3480_v61  ;;  %3844 = vmatpush3.msra.mxu0 %v3458_v48 }
 0x4fd   :  { %3879 = vmatprep.subr.mxu1 %v5985_v12  ;;  %3845 = vmatprep.subr.mxu0 %v5985_v12 }
 0x4fe   :  { %3880 = vmatpush3.msra.mxu1 %v3479_v38  ;;  %3846 = vmatpush3.msra.mxu0 %v3457_v27 }
 0x4ff   :  { %3881 = vmatprep.subr.mxu1 %v5985_v12  ;;  %3847 = vmatprep.subr.mxu0 %v5985_v12 }
 0x500   :  { %3882 = vmatpush3.msra.mxu1 %v3478_v58  ;;  %3848 = vmatpush3.msra.mxu0 %v3456_v59  ;;  %v2938_v58 = vld [vmem:[%s5977_s10 + $0x18] sm:$0xff]  ;;  %v2937_v59 = vld [vmem:[%s5977_s10 + $0x10] sm:$0xff] }
 0x501   :  { %3883 = vmatprep.subr.mxu1 %v5985_v12  ;;  %3849 = vmatprep.subr.mxu0 %v5985_v12 }
 0x502   :  { %3884 = vmatpush3.msra.mxu1 %v3477_v43  ;;  %3850 = vmatpush3.msra.mxu0 %v3455_v60  ;;  %v2936_v43 = vld [vmem:[%s5977_s10 + $0x8] sm:$0xff]  ;;  %v2935_v60 = vld [vmem:[%s5977_s10] sm:$0xff] }
 0x503   :  { %3885 = vmatprep.subr.mxu1 %v5985_v12  ;;  %3851 = vmatprep.subr.mxu0 %v5985_v12 }
 0x504   :  { %3886 = vmatpush3.msra.mxu1 %v3476_v10  ;;  %3852 = vmatpush3.msra.mxu0 %v3454_v31  ;;  %v3502_v31 = vld [vmem:[%s5976_s9] ss:$0 sm:$0xff] }
 0x505   :  { %3887 = vmatprep.subr.mxu1 %v5985_v12  ;;  %3853 = vmatprep.subr.mxu0 %v5985_v12 }
 0x506   :  { %3888 = vmatpush3.msra.mxu1 %v3475_v11  ;;  %3854 = vmatpush3.msra.mxu0 %v3453_v5 }
 0x507   :  { %3889 = vmatprep.subr.mxu1 %v5985_v12  ;;  %3855 = vmatprep.subr.mxu0 %v5985_v12 }
 0x508   :  { %3890 = vmatpush3.msra.mxu1 %v3474_v17  ;;  %3856 = vmatpush3.msra.mxu0 %v3452_v2 }
 0x509   :  { %3891 = vmatprep.subr.mxu1 %v5985_v12  ;;  %3857 = vmatprep.subr.mxu0 %v5985_v12 }
 0x50a   :  { %3892 = vmatpush3.msra.mxu1 %v3473_v3  ;;  %3903 = vmatprep.mubr.msk.f32.mxu1 %vm4060_vm7, %v5985_v12  ;;  %v3042_v3 = vld [vmem:[%s5979_s12 + $0x50] sm:$0xf] }
 0x50b   :  { %3893 = vmatprep.subr.mxu1 %v5985_v12  ;;  %3858 = vmatpush3.msra.mxu0 %v3451_v47  ;;  %v3040_v47 = vld [vmem:[%s5979_s12 + $0x40] sm:$0xff] }
 0x50c   :  { %3894 = vmatpush3.msra.mxu1 %v3472_v45  ;;  %3859 = vmatprep.subr.mxu0 %v5985_v12  ;;  %v3041_v45 = vld [vmem:[%s5979_s12 + $0x48] sm:$0xff] }
 0x50d   :  { %3895 = vmatprep.subr.mxu1 %v5985_v12  ;;  %3860 = vmatpush3.msra.mxu0 %v3450_v26  ;;  %v3038_v26 = vld [vmem:[%s5979_s12 + $0x30] sm:$0xff] }
 0x50e   :  { %3896 = vmatpush3.msra.mxu1 %v3471_v14  ;;  %3906 = vmatprep.subr.mxu0 %v5985_v12  ;;  %v3039_v14 = vld [vmem:[%s5979_s12 + $0x38] sm:$0xff] }
 0x50f   :  { %3897 = vmatprep.subr.mxu1 %v5985_v12 }
 0x510   :  { %3898 = vmatpush3.msra.mxu1 %v3470_v51  ;;  %v3037_v51 = vld [vmem:[%s5979_s12 + $0x28] sm:$0xff] }
 0x511   :  { %3899 = vmatprep.subr.mxu1 %v5985_v12 }
 0x512   :  { %3900 = vmatpush3.msra.mxu1 %v3469_v7  ;;  %v3036_v7 = vld [vmem:[%s5979_s12 + $0x20] sm:$0xff] }
 0x513   :  { %3901 = vmatprep.subr.mxu1 %v5985_v12 }
 0x514   :  { %3902 = vmatpush3.msra.mxu1 %v3468_v41  ;;  %v3035_v41 = vld [vmem:[%s5979_s12 + $0x18] sm:$0xff] }
 0x515   :  { %3948 = vmatprep.subr.mxu1 %v5985_v12 }
 0x5a9   :  { %v2433_v15 = vpop.f32.mrf.mxu0 }
 0x5ab   :  { %v3821_v9 = vpop.f32.mrf.mxu0 }
 0x5ac   :  { %v3033_v9 = vld [vmem:[%s5979_s12 + $0x8] sm:$0xff] }
 0x5ad   :  { %v2363_v30 = vpop.f32.mrf.mxu1 }
 0x5ae   :  { %v5771_v34 = vadd.f32 %v2433_v15, %v2363_v30  ;;  %v3034_v15 = vld [vmem:[%s5979_s12 + $0x10] sm:$0xff]  ;;  %v3032_v30 = vld [vmem:[%s5979_s12] sm:$0xff] }
 0x5af   :  { %v3786_v18 = vpop.f32.mrf.mxu1 }
 0x5b1   :  { %v2508_v23 = vpop.f32.mrf.mxu1 }
 0x5b2   :  { %3862 = vmatmul.mubr.f32.vlgmr.msra.gmra.mxu0 %v2508_v23 }
 0x5b3   :  { %3907 = vmatpush3.msk.msra.mxu0 %vm2115_vm8, %v5531_v49  ;;  %v3828_v52 = vpop.f32.mrf.mxu1  ;;  %3910 = vmatprep.mubr.msk.f32.mxu0 %vm4060_vm7, %v5985_v12  ;;  %v3500_v49 = vld [vmem:[%s5975_s8 + $0x270] sm:$0xff] }
 0x5b4   :  { %3908 = vmatprep.subr.mxu0 %v5985_v12 }
 0x5b5   :  { %3909 = vmatpush3.msra.mxu0 %v5533_v0  ;;  %v2671_v16 = vpop.f32.mrf.mxu1  ;;  %v3499_v0 = vld [vmem:[%s5975_s8 + $0x268] sm:$0xff]  ;;  %s4061_s8 = smov [#allocation5]  }
 0x5b6   :  { %3904 = vmatmul.mubr.f32.vlgmr.msra.gmra.mxu1 %v2671_v16  ;;  %3911 = vmatmul.mubr.msk.f32.vlgmr.msra.gmra.mxu0 %vm2111_vm9, %v2764_v46  ;;  %v3505_v16 = vld [vmem:[%s5980_s13] ss:$0 sm:$0xff]  ;;  %s3135_s25 = sshll.u32 %s4061_s8, 4  ;;  %s3136_s25 = int_to_ptr.vmem [resolvable:$true] %s3135_s25 }
 0x5b7   :  { %3913 = vmatprep.subr.mxu0 %v5985_v12  ;;  %v3870_v1 = vpop.f32.mrf.mxu1  ;;  %3945 = vmatprep.mubr.msk.f32.mxu0 %vm4060_vm7, %v5985_v12  ;;  %s4032_s12 = scalar_lea.vmem %s3136_s25, 32  ;;  %p4037_p6 = scmp.lt.s32.totalorder %s3136_s25, %s3136_s25 }
 0x5b8   :  { %3914 = vmatpush3.msra.mxu0 %v3501_v63  ;;  %3978 = vmatprep.mubr.msk.f32.mxu1 %vm4060_vm7, %v5985_v12  ;;  %p4033_p5 = scmp.ne.s32.totalorder %s3136_s25, %s4032_s12  ;;  %p4038_p7 = scmp.lt.s32.totalorder %s4032_s12, %s4032_s12 }
 0x5b9   :  { %3915 = vmatprep.subr.mxu0 %v5985_v12  ;;  %3949 = vmatpush3.msra.mxu1 %v2949_v21 }
 0x5ba   :  { %3916 = vmatpush3.msra.mxu0 %v3500_v49  ;;  %3950 = vmatprep.subr.mxu1 %v5985_v12  ;;  %p4039_p8 = por %p4038_p7, %p4037_p6 }
 0x5bb   :  { %3917 = vmatprep.subr.mxu0 %v5985_v12  ;;  %3951 = vmatpush3.msra.mxu1 %v2948_v29 }
 0x5bc   :  { %3918 = vmatpush3.msra.mxu0 %v3499_v0  ;;  %3952 = vmatprep.subr.mxu1 %v5985_v12  ;;  %p4040_p9 = pnand %p4039_p8, %p4033_p5 }
 0x5bd   :  { %3919 = vmatprep.subr.mxu0 %v5985_v12  ;;  %3953 = vmatpush3.msra.mxu1 %v2947_v32 }
 0x5be   :  { %3920 = vmatpush3.msra.mxu0 %v3498_v53  ;;  %3954 = vmatprep.subr.mxu1 %v5985_v12 }
 0x5bf   :  { %3921 = vmatprep.subr.mxu0 %v5985_v12  ;;  %3955 = vmatpush3.msra.mxu1 %v2946_v25 }
 0x5c0   :  { %3922 = vmatpush3.msra.mxu0 %v3497_v33  ;;  %3956 = vmatprep.subr.mxu1 %v5985_v12 }
 0x5c1   :  { %3923 = vmatprep.subr.mxu0 %v5985_v12  ;;  %3957 = vmatpush3.msra.mxu1 %v2945_v6 }
 0x5c2   :  { %3924 = vmatpush3.msra.mxu0 %v3496_v36  ;;  %3958 = vmatprep.subr.mxu1 %v5985_v12 }
 0x5c3   :  { %3925 = vmatprep.subr.mxu0 %v5985_v12  ;;  %3959 = vmatpush3.msra.mxu1 %v2944_v56 }
 0x5c4   :  { %3926 = vmatpush3.msra.mxu0 %v3495_v13  ;;  %3960 = vmatprep.subr.mxu1 %v5985_v12 }
 0x5c5   :  { %3927 = vmatprep.subr.mxu0 %v5985_v12  ;;  %3961 = vmatpush3.msra.mxu1 %v2943_v44 }
 0x5c6   :  { %3928 = vmatpush3.msra.mxu0 %v3494_v39  ;;  %3962 = vmatprep.subr.mxu1 %v5985_v12 }
 0x5c7   :  { %3929 = vmatprep.subr.mxu0 %v5985_v12  ;;  %3963 = vmatpush3.msra.mxu1 %v2942_v8 }
 0x5c8   :  { %3930 = vmatpush3.msra.mxu0 %v3493_v19  ;;  %3964 = vmatprep.subr.mxu1 %v5985_v12 }
 0x5c9   :  { %3931 = vmatprep.subr.mxu0 %v5985_v12  ;;  %3965 = vmatpush3.msra.mxu1 %v2941_v50 }
 0x5ca   :  { %3932 = vmatpush3.msra.mxu0 %v3492_v62  ;;  %3966 = vmatprep.subr.mxu1 %v5985_v12 }
 0x5cb   :  { %3933 = vmatprep.subr.mxu0 %v5985_v12  ;;  %3967 = vmatpush3.msra.mxu1 %v2940_v22 }
 0x5cc   :  { %3934 = vmatpush3.msra.mxu0 %v3491_v35  ;;  %3968 = vmatprep.subr.mxu1 %v5985_v12 }
 0x5cd   :  { %3935 = vmatprep.subr.mxu0 %v5985_v12  ;;  %3969 = vmatpush3.msra.mxu1 %v2939_v24 }
 0x5ce   :  { %3936 = vmatpush3.msra.mxu0 %v3490_v37  ;;  %3970 = vmatprep.subr.mxu1 %v5985_v12 }
 0x5cf   :  { %3937 = vmatprep.subr.mxu0 %v5985_v12  ;;  %3971 = vmatpush3.msra.mxu1 %v2938_v58 }
 0x5d0   :  { %3938 = vmatpush3.msra.mxu0 %v3489_v54  ;;  %3972 = vmatprep.subr.mxu1 %v5985_v12 }
 0x5d1   :  { %3939 = vmatprep.subr.mxu0 %v5985_v12  ;;  %3973 = vmatpush3.msra.mxu1 %v2937_v59 }
 0x5d2   :  { %3940 = vmatpush3.msra.mxu0 %v3488_v55  ;;  %3974 = vmatprep.subr.mxu1 %v5985_v12 }
 0x5d3   :  { %3941 = vmatprep.subr.mxu0 %v5985_v12  ;;  %3975 = vmatpush3.msra.mxu1 %v2936_v43 }
 0x5d4   :  { %3942 = vmatpush3.msra.mxu0 %v3487_v40  ;;  %3976 = vmatprep.subr.mxu1 %v5985_v12 }
 0x5d5   :  { %3943 = vmatprep.subr.mxu0 %v5985_v12  ;;  %3977 = vmatpush3.msra.mxu1 %v2935_v60 }
 0x5d6   :  { %3944 = vmatpush3.msra.mxu0 %v3486_v20  ;;  %3981 = vmatprep.subr.mxu1 %v5985_v12 }
 0x672   :  { %v2595_v57 = vpop.f32.mrf.mxu0 }
 0x673   :  { %v2599_v4 = vadd.f32 %v2595_v57, %v5771_v34  ;;  %v3503_v34 = vld [vmem:[%s5978_s11] ss:$0 sm:$0xff] }
 0x674   :  { %v3863_v42 = vpop.f32.mrf.mxu0 }
 0x676   :  { %v2758_v28 = vpop.f32.mrf.mxu1  ;;  %v2834_v61 = vpop.f32.mrf.mxu0 }
 0x677   :  { %v2762_v48 = vadd.f32 %v2758_v28, %v2599_v4  ;;  %3946 = vmatmul.mubr.f32.vlgmr.msra.gmra.mxu0 %v2834_v61 }
 0x678   :  { %v3912_v38 = vpop.f32.mrf.mxu0  ;;  %v3905_v27 = vpop.f32.mrf.mxu1 }
 0x737   :  { %v2921_v10 = vpop.f32.mrf.mxu0 }
 0x738   :  { %v2925_v11 = vadd.f32 %v2921_v10, %v2762_v48 }
 0x739   :  { %v3947_v5 = vpop.f32.mrf.mxu0 }
 0x73a   :  { %v2933_v17 = vadd.f32 %v3502_v31, %v2925_v11 }
 0x73c   :  { %v2934_v2 = vmax.f32 %v2933_v17, 0.0 }
 0x73e   :  { %3979 = vmatmul.mubr.msk.f32.vlgmr.msra.gmra.mxu1 %vm2957_vm10, %v2934_v2 }
 0x73f   :  { %3982 = vmatpush3.msk.msra.mxu1 %vm1796_vm3, %v3042_v3  ;;  %4003 = vmatprep.mubr.msk.f32.mxu1 %vm4060_vm7, %v5985_v12 }
 0x740   :  { %3983 = vmatprep.subr.mxu1 %v5985_v12 }
 0x741   :  { %3984 = vmatpush3.msra.mxu1 %v3041_v45 }
 0x742   :  { %3985 = vmatprep.subr.mxu1 %v5985_v12 }
 0x743   :  { %3986 = vmatpush3.msra.mxu1 %v3040_v47 }
 0x744   :  { %3987 = vmatprep.subr.mxu1 %v5985_v12 }
 0x745   :  { %3988 = vmatpush3.msra.mxu1 %v3039_v14 }
 0x746   :  { %3989 = vmatprep.subr.mxu1 %v5985_v12 }
 0x747   :  { %3990 = vmatpush3.msra.mxu1 %v3038_v26 }
 0x748   :  { %3991 = vmatprep.subr.mxu1 %v5985_v12 }
 0x749   :  { %3992 = vmatpush3.msra.mxu1 %v3037_v51 }
 0x74a   :  { %3993 = vmatprep.subr.mxu1 %v5985_v12 }
 0x74b   :  { %3994 = vmatpush3.msra.mxu1 %v3036_v7 }
 0x74c   :  { %3995 = vmatprep.subr.mxu1 %v5985_v12 }
 0x74d   :  { %3996 = vmatpush3.msra.mxu1 %v3035_v41 }
 0x74e   :  { %3997 = vmatprep.subr.mxu1 %v5985_v12 }
 0x74f   :  { %3998 = vmatpush3.msra.mxu1 %v3034_v15 }
 0x750   :  { %3999 = vmatprep.subr.mxu1 %v5985_v12 }
 0x751   :  { %4000 = vmatpush3.msra.mxu1 %v3033_v9 }
 0x752   :  { %4001 = vmatprep.subr.mxu1 %v5985_v12 }
 0x753   :  { %4002 = vmatpush3.msra.mxu1 %v3032_v30 }
 0x7fe   :  { %v3027_v18 = vpop.f32.mrf.mxu1 }
 0x7ff   :  { %v3028_v23 = vadd.f32 %v3503_v34, %v3027_v18 }
 0x800   :  { %v3980_v52 = vpop.f32.mrf.mxu1 }
 0x801   :  { %v3031_v46 = vmax.f32 %v3028_v23, 0.0 }
 0x803   :  { %4004 = vmatmul.mubr.msk.f32.vlgmr.msra.gmra.mxu1 %vm3050_vm11, %v3031_v46 }
 0x8c3   :  { %v3123_v63 = vpop.f32.mrf.mxu1 }
 0x8c4   :  { %v3124_v12 = vadd.f32 %v3505_v16, %v3123_v63 }
 0x8c5   :  { %v4005_v49 = vpop.f32.mrf.mxu1 }
 0x8c6   :  { %3128 = vst.msk [vmem:[#allocation5] sm:$0x3] %vm3127_vm12, %v3124_v12 }
 0x8c7   :  { %4043 = shalt.err (!%p4040_p9)
}
 0x8c8   :  { %3138 = dma.vmem_to_hbm [thread:$0]  %s3136_s25, 32, %s5981_s14, [#allocation4]  }
 0x8c9   :  { %4054 = dma.done.wait [#allocation4], 32  }
 0x8ca   :  { %4055 = vsyncadd [#allocation4], 4294967264 }
 0x8cb   :  { %3142 = vsyncpa [#allocation3], 1 }
 0x8cc   :  { %3143 = vsyncpa [#allocation4], 1 }

</bundles_post_ra>
